<compile_context>
chip_gen: v5e
topology: v5e:2x2
jax: 0.10.0
libtpu: 0.0.40
codegen_flags: <defaults>
</compile_context>

<pallas_src>
from functools import partial

import numpy as np
import jax
import jax.numpy as jnp
from jax import lax
from jax.experimental import pallas as pl
from jax.experimental.pallas import tpu as pltpu

BG = 8  # sequences handled per grid step (one sublane group)


# ------------------------- fused decoder kernel ---------------------------
def _decoder_gru_kernel(h_ref, x_ref, wi_ref, bi_ref, wh_ref, bh_ref,
                        how_ref, hob_ref, o_ref, dec_ref, *, T, H, G):
    f32 = jnp.float32

    # Hoisted input projection for all T timesteps and both directions:
    # (T*BG, Z) @ (Z, 2G) -> (T*BG, 2G); lanes [0:3H) = fwd gates (r,z,n),
    # lanes [G:G+3H) = bwd gates, pad lanes are zero.
    gi_all = jnp.dot(x_ref[...], wi_ref[...], preferred_element_type=f32) + bi_ref[...]

    wh = wh_ref[...]          # (2H, 2G) block-diagonal [wh_f | wh_b]
    bh = bh_ref[...]          # (1, 2G)
    h_cat = h_ref[...]        # (BG, 2H) = [h_f | h_b]

    def gates(gi, gh, h_prev):
        # PyTorch GRU gate equations, gate order (r, z, n); gi includes b_ih,
        # gh includes b_hh.
        r = jax.nn.sigmoid(gi[:, :H] + gh[:, :H])
        zg = jax.nn.sigmoid(gi[:, H:2 * H] + gh[:, H:2 * H])
        n = jnp.tanh(gi[:, 2 * H:3 * H] + r * gh[:, 2 * H:3 * H])
        return (1.0 - zg) * n + zg * h_prev

    # Fully unrolled recurrence (T static & small).  One block-diagonal matmul
    # drives BOTH directions per step; forward walks t, backward walks T-1-t.
    for i in range(T):
        tf = i
        tb = T - 1 - i
        gh_all = jnp.dot(h_cat, wh, preferred_element_type=f32) + bh    # (BG, 2G)

        gi_f = gi_all[tf * BG:(tf + 1) * BG, :G]        # 128-lane aligned slices,
        gi_b = gi_all[tb * BG:(tb + 1) * BG, G:]        # 8-sublane aligned rows
        h_f = gates(gi_f, gh_all[:, :G], h_cat[:, :H])
        h_b = gates(gi_b, gh_all[:, G:], h_cat[:, H:])

        dec_ref[tf * BG:(tf + 1) * BG, :H] = h_f
        dec_ref[tb * BG:(tb + 1) * BG, H:2 * H] = h_b
        h_cat = jnp.concatenate([h_f, h_b], axis=-1)

    # hidden_to_output on the assembled (T*BG, 2H) decoder output (lane-padded F).
    o_ref[...] = (jnp.dot(dec_ref[...], how_ref[...], preferred_element_type=f32)
                  + hob_ref[...])


# ---------------------------- Parameter init -------------------------------
def init_decoder_params(key, zdims, num_features, hidden):
    H, Z, F = hidden, zdims, num_features
    ks = jax.random.split(key, 12)
    u = lambda k, shape, s: jax.random.uniform(k, shape, jnp.float32, -s, s)
    s_l1 = 1.0 / np.sqrt(Z)
    s_gr = 1.0 / np.sqrt(H)
    s_l2 = 1.0 / np.sqrt(2 * H)
    return dict(
        l2h_w=u(ks[0], (2 * H, Z), s_l1),       # latent_to_hidden.weight
        l2h_b=u(ks[1], (2 * H,), s_l1),         # latent_to_hidden.bias
        w_ih_f=u(ks[2], (3 * H, Z), s_gr),      # rnn_rec.weight_ih_l0
        w_hh_f=u(ks[3], (3 * H, H), s_gr),      # rnn_rec.weight_hh_l0
        b_ih_f=u(ks[4], (3 * H,), s_gr),
        b_hh_f=u(ks[5], (3 * H,), s_gr),
        w_ih_b=u(ks[6], (3 * H, Z), s_gr),      # *_l0_reverse
        w_hh_b=u(ks[7], (3 * H, H), s_gr),
        b_ih_b=u(ks[8], (3 * H,), s_gr),
        b_hh_b=u(ks[9], (3 * H,), s_gr),
        h2o_w=u(ks[10], (F, 2 * H), s_l2),      # hidden_to_output.weight
        h2o_b=u(ks[11], (F,), s_l2),            # hidden_to_output.bias
    )


def pack_decoder_params(params):
    """One-time packing of weights into kernel-friendly, lane-padded layouts."""
    H = params["w_hh_f"].shape[1]
    Z = params["l2h_w"].shape[1]
    F = params["h2o_w"].shape[0]
    G = ((3 * H + 127) // 128) * 128            # lane-padded per-direction gate width
    Fp = ((F + 127) // 128) * 128               # lane-padded output width

    wi = jnp.zeros((Z, 2 * G), jnp.float32)
    wi = wi.at[:, :3 * H].set(jnp.asarray(params["w_ih_f"]).T)
    wi = wi.at[:, G:G + 3 * H].set(jnp.asarray(params["w_ih_b"]).T)
    bi = jnp.zeros((1, 2 * G), jnp.float32)
    bi = bi.at[0, :3 * H].set(jnp.asarray(params["b_ih_f"]))
    bi = bi.at[0, G:G + 3 * H].set(jnp.asarray(params["b_ih_b"]))

    # block-diagonal recurrent weight: rows [0:H) -> fwd gates, rows [H:2H) -> bwd gates
    wh_blk = jnp.zeros((2 * H, 2 * G), jnp.float32)
    wh_blk = wh_blk.at[:H, :3 * H].set(jnp.asarray(params["w_hh_f"]).T)
    wh_blk = wh_blk.at[H:, G:G + 3 * H].set(jnp.asarray(params["w_hh_b"]).T)
    bh_cat = jnp.zeros((1, 2 * G), jnp.float32)
    bh_cat = bh_cat.at[0, :3 * H].set(jnp.asarray(params["b_hh_f"]))
    bh_cat = bh_cat.at[0, G:G + 3 * H].set(jnp.asarray(params["b_hh_b"]))

    h2o_wT = jnp.zeros((2 * H, Fp), jnp.float32).at[:, :F].set(jnp.asarray(params["h2o_w"]).T)
    h2o_b = jnp.zeros((1, Fp), jnp.float32).at[0, :F].set(jnp.asarray(params["h2o_b"]))

    return dict(
        l2h_wT=jnp.asarray(params["l2h_w"]).T,    # (Z, 2H)
        l2h_b=jnp.asarray(params["l2h_b"])[None, :],
        wi=wi, bi=bi,                             # (Z, 2G), (1, 2G)
        wh_blk=wh_blk, bh_cat=bh_cat,             # (2H, 2G), (1, 2G)
        h2o_wT=h2o_wT, h2o_b=h2o_b,               # (2H, Fp), (1, Fp)
    )


# ----------------------------- Decoder forward -----------------------------
@partial(jax.jit, static_argnums=(3,))
def decoder_forward(packed, inputs, z, num_features):
    B, T, Z = inputs.shape
    H = packed["wh_blk"].shape[0] // 2
    G = packed["wh_blk"].shape[1] // 2
    Fp = packed["h2o_b"].shape[-1]
    F = num_features

    num_groups = -(-B // BG)
    Bp = num_groups * BG

    # latent_to_hidden + torch .view(2, B, H) split.  Tiny (B x 2H x Z) op kept
    # in XLA: the view mixes batch rows across grid groups so it cannot be done
    # per-group inside the kernel.  Padded rows are zero (sliced away later).
    hidden = jnp.dot(z, packed["l2h_wT"]) + packed["l2h_b"]        # (B, 2H)
    hidden = hidden.reshape(2, B, H)                               # == torch .view(2, B, H)
    h_cat = jnp.concatenate([hidden[0], hidden[1]], axis=-1)       # (B, 2H) = [h_f | h_b]
    h_cat = jnp.pad(h_cat, ((0, Bp - B), (0, 0)))                  # (Bp, 2H)

    # (B, T, Z) -> group-major, time-major within group, batch on sublanes.
    x = jnp.pad(inputs, ((0, Bp - B), (0, 0), (0, 0)))             # (Bp, T, Z)
    x = x.reshape(num_groups, BG, T, Z).transpose(0, 2, 1, 3)      # (g, T, BG, Z)
    x_flat = x.reshape(num_groups * T * BG, Z)

    kernel = partial(_decoder_gru_kernel, T=T, H=H, G=G)
    out = pl.pallas_call(
        kernel,
        out_shape=jax.ShapeDtypeStruct((num_groups * T * BG, Fp), jnp.float32),
        grid_spec=pltpu.PrefetchScalarGridSpec(
            num_scalar_prefetch=0,
            grid=(num_groups,),
            in_specs=[
                pl.BlockSpec((BG, 2 * H), lambda g: (g, 0)),        # h0 per group
                pl.BlockSpec((T * BG, Z), lambda g: (g, 0)),        # inputs per group
                pl.BlockSpec((Z, 2 * G), lambda g: (0, 0)),         # weights: constant
                pl.BlockSpec((1, 2 * G), lambda g: (0, 0)),         #   index_map ->
                pl.BlockSpec((2 * H, 2 * G), lambda g: (0, 0)),     #   VMEM-resident
                pl.BlockSpec((1, 2 * G), lambda g: (0, 0)),
                pl.BlockSpec((2 * H, Fp), lambda g: (0, 0)),
                pl.BlockSpec((1, Fp), lambda g: (0, 0)),
            ],
            out_specs=pl.BlockSpec((T * BG, Fp), lambda g: (g, 0)),
            scratch_shapes=[pltpu.VMEM((T * BG, 2 * H), jnp.float32)],
        ),
        compiler_params=pltpu.CompilerParams(
            dimension_semantics=("parallel",)),
    )(h_cat, x_flat,
      packed["wi"], packed["bi"],
      packed["wh_blk"], packed["bh_cat"],
      packed["h2o_wT"], packed["h2o_b"])

    # (g*T*BG, Fp) time-major rows -> (B, T, F) batch-first; drop padding.
    pred = out.reshape(num_groups, T, BG, Fp).transpose(0, 2, 1, 3)
    pred = pred.reshape(Bp, T, Fp)[:B, :, :F]
    return pred


# --------------------------- Pure-JAX reference -----------------------------
def decoder_reference(params, inputs, z, hidden_size):
    B, T, Z = inputs.shape
    H = hidden_size
    hidden = z @ params["l2h_w"].T + params["l2h_b"]
    hidden = hidden.reshape(2, B, H)
    h0f, h0b = hidden[0], hidden[1]

    def gru_dir(x_tbz, h0, w_ih, w_hh, b_ih, b_hh, reverse):
        wi, wh = w_ih.T, w_hh.T

        def step(h, x_t):
            gi = x_t @ wi + b_ih
            gh = h @ wh + b_hh
            r = jax.nn.sigmoid(gi[:, :H] + gh[:, :H])
            zg = jax.nn.sigmoid(gi[:, H:2 * H] + gh[:, H:2 * H])
            n = jnp.tanh(gi[:, 2 * H:] + r * gh[:, 2 * H:])
            h_new = (1.0 - zg) * n + zg * h
            return h_new, h_new

        xs = x_tbz[::-1] if reverse else x_tbz
        _, ys = lax.scan(step, h0, xs)
        return ys[::-1] if reverse else ys

    x_tbz = jnp.transpose(inputs, (1, 0, 2))
    of = gru_dir(x_tbz, h0f, params["w_ih_f"], params["w_hh_f"],
                 params["b_ih_f"], params["b_hh_f"], reverse=False)
    ob = gru_dir(x_tbz, h0b, params["w_ih_b"], params["w_hh_b"],
                 params["b_ih_b"], params["b_hh_b"], reverse=True)
    dec = jnp.transpose(jnp.concatenate([of, ob], axis=-1), (1, 0, 2))
    return dec @ params["h2o_w"].T + params["h2o_b"]


# ----------------------------------- main -----------------------------------
if __name__ == "__main__":
    TEMPORAL_WINDOW = 8     # sequence length
    ZDIMS = 16              # latent / GRU input size
    NUM_FEATURES = 12       # output feature size
    HIDDEN = 32             # hidden_size_rec
    BATCH = 10              # exercises batch padding (->16) and a 2-step parallel grid

    key = jax.random.PRNGKey(0)
    kp, kx, kz = jax.random.split(key, 3)
    params = init_decoder_params(kp, ZDIMS, NUM_FEATURES, HIDDEN)
    packed = pack_decoder_params(params)
    inputs = jax.random.normal(kx, (BATCH, TEMPORAL_WINDOW, ZDIMS), jnp.float32)
    z = jax.random.normal(kz, (BATCH, ZDIMS), jnp.float32)

    pred = decoder_forward(packed, inputs, z, NUM_FEATURES)
    pred = jax.block_until_ready(pred)

    ref = decoder_reference(params, inputs, z, HIDDEN)
    assert pred.shape == (BATCH, TEMPORAL_WINDOW, NUM_FEATURES)
    assert np.all(np.isfinite(np.asarray(pred)))
    err = float(np.max(np.abs(np.asarray(pred) - np.asarray(ref))))
    assert np.allclose(np.asarray(pred), np.asarray(ref), atol=1e-2, rtol=1e-2), err
    print("KERNEL_OK")
</pallas_src>

<mosaic_0001>
module attributes {stable_mosaic.version = 11 : i64} {
  func.func @_decoder_gru_kernel(%arg0: i32, %arg1: memref<8x64xf32, #tpu.memory_space<vmem>>, %arg2: memref<64x16xf32, #tpu.memory_space<vmem>>, %arg3: memref<16x256xf32, #tpu.memory_space<vmem>>, %arg4: memref<1x256xf32, #tpu.memory_space<vmem>>, %arg5: memref<64x256xf32, #tpu.memory_space<vmem>>, %arg6: memref<1x256xf32, #tpu.memory_space<vmem>>, %arg7: memref<64x128xf32, #tpu.memory_space<vmem>>, %arg8: memref<1x128xf32, #tpu.memory_space<vmem>>, %arg9: memref<64x128xf32, #tpu.memory_space<vmem>>, %arg10: memref<64x64xf32, #tpu.memory_space<vmem>>) attributes {dimension_semantics = [#tpu.dimension_semantics<parallel>], iteration_bounds = array<i64: 2>, scalar_prefetch = 0 : i64, scratch_operands = 1 : i64, tpu.core_type = #tpu.core_type<tc>, window_params = [{transform_indices = @transform_0, window_bounds = array<i64: 8, 64>}, {transform_indices = @transform_1, window_bounds = array<i64: 64, 16>}, {pipeline_mode = #tpu.pipeline_mode<synchronous>, transform_indices = @transform_2, window_bounds = array<i64: 16, 256>}, {pipeline_mode = #tpu.pipeline_mode<synchronous>, transform_indices = @transform_3, window_bounds = array<i64: 1, 256>}, {pipeline_mode = #tpu.pipeline_mode<synchronous>, transform_indices = @transform_4, window_bounds = array<i64: 64, 256>}, {pipeline_mode = #tpu.pipeline_mode<synchronous>, transform_indices = @transform_5, window_bounds = array<i64: 1, 256>}, {pipeline_mode = #tpu.pipeline_mode<synchronous>, transform_indices = @transform_6, window_bounds = array<i64: 64, 128>}, {pipeline_mode = #tpu.pipeline_mode<synchronous>, transform_indices = @transform_7, window_bounds = array<i64: 1, 128>}, {transform_indices = @transform_8, window_bounds = array<i64: 64, 128>}]} {
    %c0 = arith.constant 0 : index
    %c0_0 = arith.constant 0 : index
    %0 = vector.load %arg2[%c0, %c0_0] : memref<64x16xf32, #tpu.memory_space<vmem>>, vector<64x16xf32>
    %c0_1 = arith.constant 0 : index
    %c0_2 = arith.constant 0 : index
    %1 = vector.load %arg3[%c0_1, %c0_2] : memref<16x256xf32, #tpu.memory_space<vmem>>, vector<16x256xf32>
    %cst = arith.constant dense<0.000000e+00> : vector<64x256xf32>
    %2 = tpu.matmul %0, %1, %cst {dimension_numbers = #tpu.dot_dimension_numbers<[1], [0], [0], [1], [0, 0, 1, 1], [], []>} : vector<64x16xf32>, vector<16x256xf32>, vector<64x256xf32> -> vector<64x256xf32>
    %c0_3 = arith.constant 0 : index
    %c0_4 = arith.constant 0 : index
    %3 = vector.load %arg4[%c0_3, %c0_4] : memref<1x256xf32, #tpu.memory_space<vmem>>, vector<1x256xf32>
    %4 = vector.broadcast %3 : vector<1x256xf32> to vector<64x256xf32>
    %5 = arith.addf %2, %4 : vector<64x256xf32>
    %c0_5 = arith.constant 0 : index
    %c0_6 = arith.constant 0 : index
    %6 = vector.load %arg5[%c0_5, %c0_6] : memref<64x256xf32, #tpu.memory_space<vmem>>, vector<64x256xf32>
    %c0_7 = arith.constant 0 : index
    %c0_8 = arith.constant 0 : index
    %7 = vector.load %arg6[%c0_7, %c0_8] : memref<1x256xf32, #tpu.memory_space<vmem>>, vector<1x256xf32>
    %c0_9 = arith.constant 0 : index
    %c0_10 = arith.constant 0 : index
    %8 = vector.load %arg1[%c0_9, %c0_10] : memref<8x64xf32, #tpu.memory_space<vmem>>, vector<8x64xf32>
    %cst_11 = arith.constant dense<0.000000e+00> : vector<8x256xf32>
    %9 = tpu.matmul %8, %6, %cst_11 {dimension_numbers = #tpu.dot_dimension_numbers<[1], [0], [0], [1], [0, 0, 1, 1], [], []>} : vector<8x64xf32>, vector<64x256xf32>, vector<8x256xf32> -> vector<8x256xf32>
    %10 = vector.broadcast %7 : vector<1x256xf32> to vector<8x256xf32>
    %11 = arith.addf %9, %10 : vector<8x256xf32>
    %12 = vector.extract_strided_slice %5 {offsets = [0, 0], sizes = [8, 128], strides = [1, 1]} : vector<64x256xf32> to vector<8x128xf32>
    %13 = vector.extract_strided_slice %5 {offsets = [56, 128], sizes = [8, 128], strides = [1, 1]} : vector<64x256xf32> to vector<8x128xf32>
    %14 = vector.extract_strided_slice %11 {offsets = [0, 0], sizes = [8, 128], strides = [1, 1]} : vector<8x256xf32> to vector<8x128xf32>
    %15 = vector.extract_strided_slice %8 {offsets = [0, 0], sizes = [8, 32], strides = [1, 1]} : vector<8x64xf32> to vector<8x32xf32>
    %16 = vector.extract_strided_slice %12 {offsets = [0, 0], sizes = [8, 32], strides = [1, 1]} : vector<8x128xf32> to vector<8x32xf32>
    %17 = vector.extract_strided_slice %14 {offsets = [0, 0], sizes = [8, 32], strides = [1, 1]} : vector<8x128xf32> to vector<8x32xf32>
    %18 = arith.addf %16, %17 : vector<8x32xf32>
    %19 = arith.negf %18 : vector<8x32xf32>
    %20 = math.exp %19 : vector<8x32xf32>
    %cst_12 = arith.constant 1.000000e+00 : f32
    %21 = vector.broadcast %cst_12 : f32 to vector<8x32xf32>
    %22 = arith.addf %21, %20 : vector<8x32xf32>
    %23 = arith.divf %21, %22 : vector<8x32xf32>
    %24 = vector.extract_strided_slice %12 {offsets = [0, 32], sizes = [8, 32], strides = [1, 1]} : vector<8x128xf32> to vector<8x32xf32>
    %25 = vector.extract_strided_slice %14 {offsets = [0, 32], sizes = [8, 32], strides = [1, 1]} : vector<8x128xf32> to vector<8x32xf32>
    %26 = arith.addf %24, %25 : vector<8x32xf32>
    %27 = arith.negf %26 : vector<8x32xf32>
    %28 = math.exp %27 : vector<8x32xf32>
    %cst_13 = arith.constant 1.000000e+00 : f32
    %29 = vector.broadcast %cst_13 : f32 to vector<8x32xf32>
    %30 = arith.addf %29, %28 : vector<8x32xf32>
    %31 = arith.divf %29, %30 : vector<8x32xf32>
    %32 = vector.extract_strided_slice %12 {offsets = [0, 64], sizes = [8, 32], strides = [1, 1]} : vector<8x128xf32> to vector<8x32xf32>
    %33 = vector.extract_strided_slice %14 {offsets = [0, 64], sizes = [8, 32], strides = [1, 1]} : vector<8x128xf32> to vector<8x32xf32>
    %34 = arith.mulf %23, %33 : vector<8x32xf32>
    %35 = arith.addf %32, %34 : vector<8x32xf32>
    %36 = math.tanh %35 : vector<8x32xf32>
    %cst_14 = arith.constant 1.000000e+00 : f32
    %37 = vector.broadcast %cst_14 : f32 to vector<8x32xf32>
    %38 = arith.subf %37, %31 : vector<8x32xf32>
    %39 = arith.mulf %38, %36 : vector<8x32xf32>
    %40 = arith.mulf %31, %15 : vector<8x32xf32>
    %41 = arith.addf %39, %40 : vector<8x32xf32>
    %42 = vector.extract_strided_slice %11 {offsets = [0, 128], sizes = [8, 128], strides = [1, 1]} : vector<8x256xf32> to vector<8x128xf32>
    %43 = vector.extract_strided_slice %8 {offsets = [0, 32], sizes = [8, 32], strides = [1, 1]} : vector<8x64xf32> to vector<8x32xf32>
    %44 = vector.extract_strided_slice %13 {offsets = [0, 0], sizes = [8, 32], strides = [1, 1]} : vector<8x128xf32> to vector<8x32xf32>
    %45 = vector.extract_strided_slice %42 {offsets = [0, 0], sizes = [8, 32], strides = [1, 1]} : vector<8x128xf32> to vector<8x32xf32>
    %46 = arith.addf %44, %45 : vector<8x32xf32>
    %47 = arith.negf %46 : vector<8x32xf32>
    %48 = math.exp %47 : vector<8x32xf32>
    %cst_15 = arith.constant 1.000000e+00 : f32
    %49 = vector.broadcast %cst_15 : f32 to vector<8x32xf32>
    %50 = arith.addf %49, %48 : vector<8x32xf32>
    %51 = arith.divf %49, %50 : vector<8x32xf32>
    %52 = vector.extract_strided_slice %13 {offsets = [0, 32], sizes = [8, 32], strides = [1, 1]} : vector<8x128xf32> to vector<8x32xf32>
    %53 = vector.extract_strided_slice %42 {offsets = [0, 32], sizes = [8, 32], strides = [1, 1]} : vector<8x128xf32> to vector<8x32xf32>
    %54 = arith.addf %52, %53 : vector<8x32xf32>
    %55 = arith.negf %54 : vector<8x32xf32>
    %56 = math.exp %55 : vector<8x32xf32>
    %cst_16 = arith.constant 1.000000e+00 : f32
    %57 = vector.broadcast %cst_16 : f32 to vector<8x32xf32>
    %58 = arith.addf %57, %56 : vector<8x32xf32>
    %59 = arith.divf %57, %58 : vector<8x32xf32>
    %60 = vector.extract_strided_slice %13 {offsets = [0, 64], sizes = [8, 32], strides = [1, 1]} : vector<8x128xf32> to vector<8x32xf32>
    %61 = vector.extract_strided_slice %42 {offsets = [0, 64], sizes = [8, 32], strides = [1, 1]} : vector<8x128xf32> to vector<8x32xf32>
    %62 = arith.mulf %51, %61 : vector<8x32xf32>
    %63 = arith.addf %60, %62 : vector<8x32xf32>
    %64 = math.tanh %63 : vector<8x32xf32>
    %cst_17 = arith.constant 1.000000e+00 : f32
    %65 = vector.broadcast %cst_17 : f32 to vector<8x32xf32>
    %66 = arith.subf %65, %59 : vector<8x32xf32>
    %67 = arith.mulf %66, %64 : vector<8x32xf32>
    %68 = arith.mulf %59, %43 : vector<8x32xf32>
    %69 = arith.addf %67, %68 : vector<8x32xf32>
    %c0_18 = arith.constant 0 : index
    %c0_19 = arith.constant 0 : index
    %70 = vector.load %arg10[%c0_18, %c0_19] : memref<64x64xf32, #tpu.memory_space<vmem>>, vector<8x32xf32>
    tpu.vector_store %arg10[%c0_18, %c0_19], %41 {strides = array<i32>} : memref<64x64xf32, #tpu.memory_space<vmem>>, vector<8x32xf32>,
    %c56 = arith.constant 56 : index
    %c32 = arith.constant 32 : index
    %71 = vector.load %arg10[%c56, %c32] : memref<64x64xf32, #tpu.memory_space<vmem>>, vector<8x32xf32>
    tpu.vector_store %arg10[%c56, %c32], %69 {strides = array<i32>} : memref<64x64xf32, #tpu.memory_space<vmem>>, vector<8x32xf32>,
    %72 = tpu.concatenate %41, %69 in 1 : vector<8x32xf32>, vector<8x32xf32> -> vector<8x64xf32>
    %cst_20 = arith.constant dense<0.000000e+00> : vector<8x256xf32>
    %73 = tpu.matmul %72, %6, %cst_20 {dimension_numbers = #tpu.dot_dimension_numbers<[1], [0], [0], [1], [0, 0, 1, 1], [], []>} : vector<8x64xf32>, vector<64x256xf32>, vector<8x256xf32> -> vector<8x256xf32>
    %74 = vector.broadcast %7 : vector<1x256xf32> to vector<8x256xf32>
    %75 = arith.addf %73, %74 : vector<8x256xf32>
    %76 = vector.extract_strided_slice %5 {offsets = [8, 0], sizes = [8, 128], strides = [1, 1]} : vector<64x256xf32> to vector<8x128xf32>
    %77 = vector.extract_strided_slice %5 {offsets = [48, 128], sizes = [8, 128], strides = [1, 1]} : vector<64x256xf32> to vector<8x128xf32>
    %78 = vector.extract_strided_slice %75 {offsets = [0, 0], sizes = [8, 128], strides = [1, 1]} : vector<8x256xf32> to vector<8x128xf32>
    %79 = vector.extract_strided_slice %72 {offsets = [0, 0], sizes = [8, 32], strides = [1, 1]} : vector<8x64xf32> to vector<8x32xf32>
    %80 = vector.extract_strided_slice %76 {offsets = [0, 0], sizes = [8, 32], strides = [1, 1]} : vector<8x128xf32> to vector<8x32xf32>
    %81 = vector.extract_strided_slice %78 {offsets = [0, 0], sizes = [8, 32], strides = [1, 1]} : vector<8x128xf32> to vector<8x32xf32>
    %82 = arith.addf %80, %81 : vector<8x32xf32>
    %83 = arith.negf %82 : vector<8x32xf32>
    %84 = math.exp %83 : vector<8x32xf32>
    %cst_21 = arith.constant 1.000000e+00 : f32
    %85 = vector.broadcast %cst_21 : f32 to vector<8x32xf32>
    %86 = arith.addf %85, %84 : vector<8x32xf32>
    %87 = arith.divf %85, %86 : vector<8x32xf32>
    %88 = vector.extract_strided_slice %76 {offsets = [0, 32], sizes = [8, 32], strides = [1, 1]} : vector<8x128xf32> to vector<8x32xf32>
    %89 = vector.extract_strided_slice %78 {offsets = [0, 32], sizes = [8, 32], strides = [1, 1]} : vector<8x128xf32> to vector<8x32xf32>
    %90 = arith.addf %88, %89 : vector<8x32xf32>
    %91 = arith.negf %90 : vector<8x32xf32>
    %92 = math.exp %91 : vector<8x32xf32>
    %cst_22 = arith.constant 1.000000e+00 : f32
    %93 = vector.broadcast %cst_22 : f32 to vector<8x32xf32>
    %94 = arith.addf %93, %92 : vector<8x32xf32>
    %95 = arith.divf %93, %94 : vector<8x32xf32>
    %96 = vector.extract_strided_slice %76 {offsets = [0, 64], sizes = [8, 32], strides = [1, 1]} : vector<8x128xf32> to vector<8x32xf32>
    %97 = vector.extract_strided_slice %78 {offsets = [0, 64], sizes = [8, 32], strides = [1, 1]} : vector<8x128xf32> to vector<8x32xf32>
    %98 = arith.mulf %87, %97 : vector<8x32xf32>
    %99 = arith.addf %96, %98 : vector<8x32xf32>
    %100 = math.tanh %99 : vector<8x32xf32>
    %cst_23 = arith.constant 1.000000e+00 : f32
    %101 = vector.broadcast %cst_23 : f32 to vector<8x32xf32>
    %102 = arith.subf %101, %95 : vector<8x32xf32>
    %103 = arith.mulf %102, %100 : vector<8x32xf32>
    %104 = arith.mulf %95, %79 : vector<8x32xf32>
    %105 = arith.addf %103, %104 : vector<8x32xf32>
    %106 = vector.extract_strided_slice %75 {offsets = [0, 128], sizes = [8, 128], strides = [1, 1]} : vector<8x256xf32> to vector<8x128xf32>
    %107 = vector.extract_strided_slice %72 {offsets = [0, 32], sizes = [8, 32], strides = [1, 1]} : vector<8x64xf32> to vector<8x32xf32>
    %108 = vector.extract_strided_slice %77 {offsets = [0, 0], sizes = [8, 32], strides = [1, 1]} : vector<8x128xf32> to vector<8x32xf32>
    %109 = vector.extract_strided_slice %106 {offsets = [0, 0], sizes = [8, 32], strides = [1, 1]} : vector<8x128xf32> to vector<8x32xf32>
    %110 = arith.addf %108, %109 : vector<8x32xf32>
    %111 = arith.negf %110 : vector<8x32xf32>
    %112 = math.exp %111 : vector<8x32xf32>
    %cst_24 = arith.constant 1.000000e+00 : f32
    %113 = vector.broadcast %cst_24 : f32 to vector<8x32xf32>
    %114 = arith.addf %113, %112 : vector<8x32xf32>
    %115 = arith.divf %113, %114 : vector<8x32xf32>
    %116 = vector.extract_strided_slice %77 {offsets = [0, 32], sizes = [8, 32], strides = [1, 1]} : vector<8x128xf32> to vector<8x32xf32>
    %117 = vector.extract_strided_slice %106 {offsets = [0, 32], sizes = [8, 32], strides = [1, 1]} : vector<8x128xf32> to vector<8x32xf32>
    %118 = arith.addf %116, %117 : vector<8x32xf32>
    %119 = arith.negf %118 : vector<8x32xf32>
    %120 = math.exp %119 : vector<8x32xf32>
    %cst_25 = arith.constant 1.000000e+00 : f32
    %121 = vector.broadcast %cst_25 : f32 to vector<8x32xf32>
    %122 = arith.addf %121, %120 : vector<8x32xf32>
    %123 = arith.divf %121, %122 : vector<8x32xf32>
    %124 = vector.extract_strided_slice %77 {offsets = [0, 64], sizes = [8, 32], strides = [1, 1]} : vector<8x128xf32> to vector<8x32xf32>
    %125 = vector.extract_strided_slice %106 {offsets = [0, 64], sizes = [8, 32], strides = [1, 1]} : vector<8x128xf32> to vector<8x32xf32>
    %126 = arith.mulf %115, %125 : vector<8x32xf32>
    %127 = arith.addf %124, %126 : vector<8x32xf32>
    %128 = math.tanh %127 : vector<8x32xf32>
    %cst_26 = arith.constant 1.000000e+00 : f32
    %129 = vector.broadcast %cst_26 : f32 to vector<8x32xf32>
    %130 = arith.subf %129, %123 : vector<8x32xf32>
    %131 = arith.mulf %130, %128 : vector<8x32xf32>
    %132 = arith.mulf %123, %107 : vector<8x32xf32>
    %133 = arith.addf %131, %132 : vector<8x32xf32>
    %c8 = arith.constant 8 : index
    %c0_27 = arith.constant 0 : index
    %134 = vector.load %arg10[%c8, %c0_27] : memref<64x64xf32, #tpu.memory_space<vmem>>, vector<8x32xf32>
    tpu.vector_store %arg10[%c8, %c0_27], %105 {strides = array<i32>} : memref<64x64xf32, #tpu.memory_space<vmem>>, vector<8x32xf32>,
    %c48 = arith.constant 48 : index
    %c32_28 = arith.constant 32 : index
    %135 = vector.load %arg10[%c48, %c32_28] : memref<64x64xf32, #tpu.memory_space<vmem>>, vector<8x32xf32>
    tpu.vector_store %arg10[%c48, %c32_28], %133 {strides = array<i32>} : memref<64x64xf32, #tpu.memory_space<vmem>>, vector<8x32xf32>,
    %136 = tpu.concatenate %105, %133 in 1 : vector<8x32xf32>, vector<8x32xf32> -> vector<8x64xf32>
    %cst_29 = arith.constant dense<0.000000e+00> : vector<8x256xf32>
    %137 = tpu.matmul %136, %6, %cst_29 {dimension_numbers = #tpu.dot_dimension_numbers<[1], [0], [0], [1], [0, 0, 1, 1], [], []>} : vector<8x64xf32>, vector<64x256xf32>, vector<8x256xf32> -> vector<8x256xf32>
    %138 = vector.broadcast %7 : vector<1x256xf32> to vector<8x256xf32>
    %139 = arith.addf %137, %138 : vector<8x256xf32>
    %140 = vector.extract_strided_slice %5 {offsets = [16, 0], sizes = [8, 128], strides = [1, 1]} : vector<64x256xf32> to vector<8x128xf32>
    %141 = vector.extract_strided_slice %5 {offsets = [40, 128], sizes = [8, 128], strides = [1, 1]} : vector<64x256xf32> to vector<8x128xf32>
    %142 = vector.extract_strided_slice %139 {offsets = [0, 0], sizes = [8, 128], strides = [1, 1]} : vector<8x256xf32> to vector<8x128xf32>
    %143 = vector.extract_strided_slice %136 {offsets = [0, 0], sizes = [8, 32], strides = [1, 1]} : vector<8x64xf32> to vector<8x32xf32>
    %144 = vector.extract_strided_slice %140 {offsets = [0, 0], sizes = [8, 32], strides = [1, 1]} : vector<8x128xf32> to vector<8x32xf32>
    %145 = vector.extract_strided_slice %142 {offsets = [0, 0], sizes = [8, 32], strides = [1, 1]} : vector<8x128xf32> to vector<8x32xf32>
    %146 = arith.addf %144, %145 : vector<8x32xf32>
    %147 = arith.negf %146 : vector<8x32xf32>
    %148 = math.exp %147 : vector<8x32xf32>
    %cst_30 = arith.constant 1.000000e+00 : f32
    %149 = vector.broadcast %cst_30 : f32 to vector<8x32xf32>
    %150 = arith.addf %149, %148 : vector<8x32xf32>
    %151 = arith.divf %149, %150 : vector<8x32xf32>
    %152 = vector.extract_strided_slice %140 {offsets = [0, 32], sizes = [8, 32], strides = [1, 1]} : vector<8x128xf32> to vector<8x32xf32>
    %153 = vector.extract_strided_slice %142 {offsets = [0, 32], sizes = [8, 32], strides = [1, 1]} : vector<8x128xf32> to vector<8x32xf32>
    %154 = arith.addf %152, %153 : vector<8x32xf32>
    %155 = arith.negf %154 : vector<8x32xf32>
    %156 = math.exp %155 : vector<8x32xf32>
    %cst_31 = arith.constant 1.000000e+00 : f32
    %157 = vector.broadcast %cst_31 : f32 to vector<8x32xf32>
    %158 = arith.addf %157, %156 : vector<8x32xf32>
    %159 = arith.divf %157, %158 : vector<8x32xf32>
    %160 = vector.extract_strided_slice %140 {offsets = [0, 64], sizes = [8, 32], strides = [1, 1]} : vector<8x128xf32> to vector<8x32xf32>
    %161 = vector.extract_strided_slice %142 {offsets = [0, 64], sizes = [8, 32], strides = [1, 1]} : vector<8x128xf32> to vector<8x32xf32>
    %162 = arith.mulf %151, %161 : vector<8x32xf32>
    %163 = arith.addf %160, %162 : vector<8x32xf32>
    %164 = math.tanh %163 : vector<8x32xf32>
    %cst_32 = arith.constant 1.000000e+00 : f32
    %165 = vector.broadcast %cst_32 : f32 to vector<8x32xf32>
    %166 = arith.subf %165, %159 : vector<8x32xf32>
    %167 = arith.mulf %166, %164 : vector<8x32xf32>
    %168 = arith.mulf %159, %143 : vector<8x32xf32>
    %169 = arith.addf %167, %168 : vector<8x32xf32>
    %170 = vector.extract_strided_slice %139 {offsets = [0, 128], sizes = [8, 128], strides = [1, 1]} : vector<8x256xf32> to vector<8x128xf32>
    %171 = vector.extract_strided_slice %136 {offsets = [0, 32], sizes = [8, 32], strides = [1, 1]} : vector<8x64xf32> to vector<8x32xf32>
    %172 = vector.extract_strided_slice %141 {offsets = [0, 0], sizes = [8, 32], strides = [1, 1]} : vector<8x128xf32> to vector<8x32xf32>
    %173 = vector.extract_strided_slice %170 {offsets = [0, 0], sizes = [8, 32], strides = [1, 1]} : vector<8x128xf32> to vector<8x32xf32>
    %174 = arith.addf %172, %173 : vector<8x32xf32>
    %175 = arith.negf %174 : vector<8x32xf32>
    %176 = math.exp %175 : vector<8x32xf32>
    %cst_33 = arith.constant 1.000000e+00 : f32
    %177 = vector.broadcast %cst_33 : f32 to vector<8x32xf32>
    %178 = arith.addf %177, %176 : vector<8x32xf32>
    %179 = arith.divf %177, %178 : vector<8x32xf32>
    %180 = vector.extract_strided_slice %141 {offsets = [0, 32], sizes = [8, 32], strides = [1, 1]} : vector<8x128xf32> to vector<8x32xf32>
    %181 = vector.extract_strided_slice %170 {offsets = [0, 32], sizes = [8, 32], strides = [1, 1]} : vector<8x128xf32> to vector<8x32xf32>
    %182 = arith.addf %180, %181 : vector<8x32xf32>
    %183 = arith.negf %182 : vector<8x32xf32>
    %184 = math.exp %183 : vector<8x32xf32>
    %cst_34 = arith.constant 1.000000e+00 : f32
    %185 = vector.broadcast %cst_34 : f32 to vector<8x32xf32>
    %186 = arith.addf %185, %184 : vector<8x32xf32>
    %187 = arith.divf %185, %186 : vector<8x32xf32>
    %188 = vector.extract_strided_slice %141 {offsets = [0, 64], sizes = [8, 32], strides = [1, 1]} : vector<8x128xf32> to vector<8x32xf32>
    %189 = vector.extract_strided_slice %170 {offsets = [0, 64], sizes = [8, 32], strides = [1, 1]} : vector<8x128xf32> to vector<8x32xf32>
    %190 = arith.mulf %179, %189 : vector<8x32xf32>
    %191 = arith.addf %188, %190 : vector<8x32xf32>
    %192 = math.tanh %191 : vector<8x32xf32>
    %cst_35 = arith.constant 1.000000e+00 : f32
    %193 = vector.broadcast %cst_35 : f32 to vector<8x32xf32>
    %194 = arith.subf %193, %187 : vector<8x32xf32>
    %195 = arith.mulf %194, %192 : vector<8x32xf32>
    %196 = arith.mulf %187, %171 : vector<8x32xf32>
    %197 = arith.addf %195, %196 : vector<8x32xf32>
    %c16 = arith.constant 16 : index
    %c0_36 = arith.constant 0 : index
    %198 = vector.load %arg10[%c16, %c0_36] : memref<64x64xf32, #tpu.memory_space<vmem>>, vector<8x32xf32>
    tpu.vector_store %arg10[%c16, %c0_36], %169 {strides = array<i32>} : memref<64x64xf32, #tpu.memory_space<vmem>>, vector<8x32xf32>,
    %c40 = arith.constant 40 : index
    %c32_37 = arith.constant 32 : index
    %199 = vector.load %arg10[%c40, %c32_37] : memref<64x64xf32, #tpu.memory_space<vmem>>, vector<8x32xf32>
    tpu.vector_store %arg10[%c40, %c32_37], %197 {strides = array<i32>} : memref<64x64xf32, #tpu.memory_space<vmem>>, vector<8x32xf32>,
    %200 = tpu.concatenate %169, %197 in 1 : vector<8x32xf32>, vector<8x32xf32> -> vector<8x64xf32>
    %cst_38 = arith.constant dense<0.000000e+00> : vector<8x256xf32>
    %201 = tpu.matmul %200, %6, %cst_38 {dimension_numbers = #tpu.dot_dimension_numbers<[1], [0], [0], [1], [0, 0, 1, 1], [], []>} : vector<8x64xf32>, vector<64x256xf32>, vector<8x256xf32> -> vector<8x256xf32>
    %202 = vector.broadcast %7 : vector<1x256xf32> to vector<8x256xf32>
    %203 = arith.addf %201, %202 : vector<8x256xf32>
    %204 = vector.extract_strided_slice %5 {offsets = [24, 0], sizes = [8, 128], strides = [1, 1]} : vector<64x256xf32> to vector<8x128xf32>
    %205 = vector.extract_strided_slice %5 {offsets = [32, 128], sizes = [8, 128], strides = [1, 1]} : vector<64x256xf32> to vector<8x128xf32>
    %206 = vector.extract_strided_slice %203 {offsets = [0, 0], sizes = [8, 128], strides = [1, 1]} : vector<8x256xf32> to vector<8x128xf32>
    %207 = vector.extract_strided_slice %200 {offsets = [0, 0], sizes = [8, 32], strides = [1, 1]} : vector<8x64xf32> to vector<8x32xf32>
    %208 = vector.extract_strided_slice %204 {offsets = [0, 0], sizes = [8, 32], strides = [1, 1]} : vector<8x128xf32> to vector<8x32xf32>
    %209 = vector.extract_strided_slice %206 {offsets = [0, 0], sizes = [8, 32], strides = [1, 1]} : vector<8x128xf32> to vector<8x32xf32>
    %210 = arith.addf %208, %209 : vector<8x32xf32>
    %211 = arith.negf %210 : vector<8x32xf32>
    %212 = math.exp %211 : vector<8x32xf32>
    %cst_39 = arith.constant 1.000000e+00 : f32
    %213 = vector.broadcast %cst_39 : f32 to vector<8x32xf32>
    %214 = arith.addf %213, %212 : vector<8x32xf32>
    %215 = arith.divf %213, %214 : vector<8x32xf32>
    %216 = vector.extract_strided_slice %204 {offsets = [0, 32], sizes = [8, 32], strides = [1, 1]} : vector<8x128xf32> to vector<8x32xf32>
    %217 = vector.extract_strided_slice %206 {offsets = [0, 32], sizes = [8, 32], strides = [1, 1]} : vector<8x128xf32> to vector<8x32xf32>
    %218 = arith.addf %216, %217 : vector<8x32xf32>
    %219 = arith.negf %218 : vector<8x32xf32>
    %220 = math.exp %219 : vector<8x32xf32>
    %cst_40 = arith.constant 1.000000e+00 : f32
    %221 = vector.broadcast %cst_40 : f32 to vector<8x32xf32>
    %222 = arith.addf %221, %220 : vector<8x32xf32>
    %223 = arith.divf %221, %222 : vector<8x32xf32>
    %224 = vector.extract_strided_slice %204 {offsets = [0, 64], sizes = [8, 32], strides = [1, 1]} : vector<8x128xf32> to vector<8x32xf32>
    %225 = vector.extract_strided_slice %206 {offsets = [0, 64], sizes = [8, 32], strides = [1, 1]} : vector<8x128xf32> to vector<8x32xf32>
    %226 = arith.mulf %215, %225 : vector<8x32xf32>
    %227 = arith.addf %224, %226 : vector<8x32xf32>
    %228 = math.tanh %227 : vector<8x32xf32>
    %cst_41 = arith.constant 1.000000e+00 : f32
    %229 = vector.broadcast %cst_41 : f32 to vector<8x32xf32>
    %230 = arith.subf %229, %223 : vector<8x32xf32>
    %231 = arith.mulf %230, %228 : vector<8x32xf32>
    %232 = arith.mulf %223, %207 : vector<8x32xf32>
    %233 = arith.addf %231, %232 : vector<8x32xf32>
    %234 = vector.extract_strided_slice %203 {offsets = [0, 128], sizes = [8, 128], strides = [1, 1]} : vector<8x256xf32> to vector<8x128xf32>
    %235 = vector.extract_strided_slice %200 {offsets = [0, 32], sizes = [8, 32], strides = [1, 1]} : vector<8x64xf32> to vector<8x32xf32>
    %236 = vector.extract_strided_slice %205 {offsets = [0, 0], sizes = [8, 32], strides = [1, 1]} : vector<8x128xf32> to vector<8x32xf32>
    %237 = vector.extract_strided_slice %234 {offsets = [0, 0], sizes = [8, 32], strides = [1, 1]} : vector<8x128xf32> to vector<8x32xf32>
    %238 = arith.addf %236, %237 : vector<8x32xf32>
    %239 = arith.negf %238 : vector<8x32xf32>
    %240 = math.exp %239 : vector<8x32xf32>
    %cst_42 = arith.constant 1.000000e+00 : f32
    %241 = vector.broadcast %cst_42 : f32 to vector<8x32xf32>
    %242 = arith.addf %241, %240 : vector<8x32xf32>
    %243 = arith.divf %241, %242 : vector<8x32xf32>
    %244 = vector.extract_strided_slice %205 {offsets = [0, 32], sizes = [8, 32], strides = [1, 1]} : vector<8x128xf32> to vector<8x32xf32>
    %245 = vector.extract_strided_slice %234 {offsets = [0, 32], sizes = [8, 32], strides = [1, 1]} : vector<8x128xf32> to vector<8x32xf32>
    %246 = arith.addf %244, %245 : vector<8x32xf32>
    %247 = arith.negf %246 : vector<8x32xf32>
    %248 = math.exp %247 : vector<8x32xf32>
    %cst_43 = arith.constant 1.000000e+00 : f32
    %249 = vector.broadcast %cst_43 : f32 to vector<8x32xf32>
    %250 = arith.addf %249, %248 : vector<8x32xf32>
    %251 = arith.divf %249, %250 : vector<8x32xf32>
    %252 = vector.extract_strided_slice %205 {offsets = [0, 64], sizes = [8, 32], strides = [1, 1]} : vector<8x128xf32> to vector<8x32xf32>
    %253 = vector.extract_strided_slice %234 {offsets = [0, 64], sizes = [8, 32], strides = [1, 1]} : vector<8x128xf32> to vector<8x32xf32>
    %254 = arith.mulf %243, %253 : vector<8x32xf32>
    %255 = arith.addf %252, %254 : vector<8x32xf32>
    %256 = math.tanh %255 : vector<8x32xf32>
    %cst_44 = arith.constant 1.000000e+00 : f32
    %257 = vector.broadcast %cst_44 : f32 to vector<8x32xf32>
    %258 = arith.subf %257, %251 : vector<8x32xf32>
    %259 = arith.mulf %258, %256 : vector<8x32xf32>
    %260 = arith.mulf %251, %235 : vector<8x32xf32>
    %261 = arith.addf %259, %260 : vector<8x32xf32>
    %c24 = arith.constant 24 : index
    %c0_45 = arith.constant 0 : index
    %262 = vector.load %arg10[%c24, %c0_45] : memref<64x64xf32, #tpu.memory_space<vmem>>, vector<8x32xf32>
    tpu.vector_store %arg10[%c24, %c0_45], %233 {strides = array<i32>} : memref<64x64xf32, #tpu.memory_space<vmem>>, vector<8x32xf32>,
    %c32_46 = arith.constant 32 : index
    %c32_47 = arith.constant 32 : index
    %263 = vector.load %arg10[%c32_46, %c32_47] : memref<64x64xf32, #tpu.memory_space<vmem>>, vector<8x32xf32>
    tpu.vector_store %arg10[%c32_46, %c32_47], %261 {strides = array<i32>} : memref<64x64xf32, #tpu.memory_space<vmem>>, vector<8x32xf32>,
    %264 = tpu.concatenate %233, %261 in 1 : vector<8x32xf32>, vector<8x32xf32> -> vector<8x64xf32>
    %cst_48 = arith.constant dense<0.000000e+00> : vector<8x256xf32>
    %265 = tpu.matmul %264, %6, %cst_48 {dimension_numbers = #tpu.dot_dimension_numbers<[1], [0], [0], [1], [0, 0, 1, 1], [], []>} : vector<8x64xf32>, vector<64x256xf32>, vector<8x256xf32> -> vector<8x256xf32>
    %266 = vector.broadcast %7 : vector<1x256xf32> to vector<8x256xf32>
    %267 = arith.addf %265, %266 : vector<8x256xf32>
    %268 = vector.extract_strided_slice %5 {offsets = [32, 0], sizes = [8, 128], strides = [1, 1]} : vector<64x256xf32> to vector<8x128xf32>
    %269 = vector.extract_strided_slice %5 {offsets = [24, 128], sizes = [8, 128], strides = [1, 1]} : vector<64x256xf32> to vector<8x128xf32>
    %270 = vector.extract_strided_slice %267 {offsets = [0, 0], sizes = [8, 128], strides = [1, 1]} : vector<8x256xf32> to vector<8x128xf32>
    %271 = vector.extract_strided_slice %264 {offsets = [0, 0], sizes = [8, 32], strides = [1, 1]} : vector<8x64xf32> to vector<8x32xf32>
    %272 = vector.extract_strided_slice %268 {offsets = [0, 0], sizes = [8, 32], strides = [1, 1]} : vector<8x128xf32> to vector<8x32xf32>
    %273 = vector.extract_strided_slice %270 {offsets = [0, 0], sizes = [8, 32], strides = [1, 1]} : vector<8x128xf32> to vector<8x32xf32>
    %274 = arith.addf %272, %273 : vector<8x32xf32>
    %275 = arith.negf %274 : vector<8x32xf32>
    %276 = math.exp %275 : vector<8x32xf32>
    %cst_49 = arith.constant 1.000000e+00 : f32
    %277 = vector.broadcast %cst_49 : f32 to vector<8x32xf32>
    %278 = arith.addf %277, %276 : vector<8x32xf32>
    %279 = arith.divf %277, %278 : vector<8x32xf32>
    %280 = vector.extract_strided_slice %268 {offsets = [0, 32], sizes = [8, 32], strides = [1, 1]} : vector<8x128xf32> to vector<8x32xf32>
    %281 = vector.extract_strided_slice %270 {offsets = [0, 32], sizes = [8, 32], strides = [1, 1]} : vector<8x128xf32> to vector<8x32xf32>
    %282 = arith.addf %280, %281 : vector<8x32xf32>
    %283 = arith.negf %282 : vector<8x32xf32>
    %284 = math.exp %283 : vector<8x32xf32>
    %cst_50 = arith.constant 1.000000e+00 : f32
    %285 = vector.broadcast %cst_50 : f32 to vector<8x32xf32>
    %286 = arith.addf %285, %284 : vector<8x32xf32>
    %287 = arith.divf %285, %286 : vector<8x32xf32>
    %288 = vector.extract_strided_slice %268 {offsets = [0, 64], sizes = [8, 32], strides = [1, 1]} : vector<8x128xf32> to vector<8x32xf32>
    %289 = vector.extract_strided_slice %270 {offsets = [0, 64], sizes = [8, 32], strides = [1, 1]} : vector<8x128xf32> to vector<8x32xf32>
    %290 = arith.mulf %279, %289 : vector<8x32xf32>
    %291 = arith.addf %288, %290 : vector<8x32xf32>
    %292 = math.tanh %291 : vector<8x32xf32>
    %cst_51 = arith.constant 1.000000e+00 : f32
    %293 = vector.broadcast %cst_51 : f32 to vector<8x32xf32>
    %294 = arith.subf %293, %287 : vector<8x32xf32>
    %295 = arith.mulf %294, %292 : vector<8x32xf32>
    %296 = arith.mulf %287, %271 : vector<8x32xf32>
    %297 = arith.addf %295, %296 : vector<8x32xf32>
    %298 = vector.extract_strided_slice %267 {offsets = [0, 128], sizes = [8, 128], strides = [1, 1]} : vector<8x256xf32> to vector<8x128xf32>
    %299 = vector.extract_strided_slice %264 {offsets = [0, 32], sizes = [8, 32], strides = [1, 1]} : vector<8x64xf32> to vector<8x32xf32>
    %300 = vector.extract_strided_slice %269 {offsets = [0, 0], sizes = [8, 32], strides = [1, 1]} : vector<8x128xf32> to vector<8x32xf32>
    %301 = vector.extract_strided_slice %298 {offsets = [0, 0], sizes = [8, 32], strides = [1, 1]} : vector<8x128xf32> to vector<8x32xf32>
    %302 = arith.addf %300, %301 : vector<8x32xf32>
    %303 = arith.negf %302 : vector<8x32xf32>
    %304 = math.exp %303 : vector<8x32xf32>
    %cst_52 = arith.constant 1.000000e+00 : f32
    %305 = vector.broadcast %cst_52 : f32 to vector<8x32xf32>
    %306 = arith.addf %305, %304 : vector<8x32xf32>
    %307 = arith.divf %305, %306 : vector<8x32xf32>
    %308 = vector.extract_strided_slice %269 {offsets = [0, 32], sizes = [8, 32], strides = [1, 1]} : vector<8x128xf32> to vector<8x32xf32>
    %309 = vector.extract_strided_slice %298 {offsets = [0, 32], sizes = [8, 32], strides = [1, 1]} : vector<8x128xf32> to vector<8x32xf32>
    %310 = arith.addf %308, %309 : vector<8x32xf32>
    %311 = arith.negf %310 : vector<8x32xf32>
    %312 = math.exp %311 : vector<8x32xf32>
    %cst_53 = arith.constant 1.000000e+00 : f32
    %313 = vector.broadcast %cst_53 : f32 to vector<8x32xf32>
    %314 = arith.addf %313, %312 : vector<8x32xf32>
    %315 = arith.divf %313, %314 : vector<8x32xf32>
    %316 = vector.extract_strided_slice %269 {offsets = [0, 64], sizes = [8, 32], strides = [1, 1]} : vector<8x128xf32> to vector<8x32xf32>
    %317 = vector.extract_strided_slice %298 {offsets = [0, 64], sizes = [8, 32], strides = [1, 1]} : vector<8x128xf32> to vector<8x32xf32>
    %318 = arith.mulf %307, %317 : vector<8x32xf32>
    %319 = arith.addf %316, %318 : vector<8x32xf32>
    %320 = math.tanh %319 : vector<8x32xf32>
    %cst_54 = arith.constant 1.000000e+00 : f32
    %321 = vector.broadcast %cst_54 : f32 to vector<8x32xf32>
    %322 = arith.subf %321, %315 : vector<8x32xf32>
    %323 = arith.mulf %322, %320 : vector<8x32xf32>
    %324 = arith.mulf %315, %299 : vector<8x32xf32>
    %325 = arith.addf %323, %324 : vector<8x32xf32>
    %c32_55 = arith.constant 32 : index
    %c0_56 = arith.constant 0 : index
    %326 = vector.load %arg10[%c32_55, %c0_56] : memref<64x64xf32, #tpu.memory_space<vmem>>, vector<8x32xf32>
    tpu.vector_store %arg10[%c32_55, %c0_56], %297 {strides = array<i32>} : memref<64x64xf32, #tpu.memory_space<vmem>>, vector<8x32xf32>,
    %c24_57 = arith.constant 24 : index
    %c32_58 = arith.constant 32 : index
    %327 = vector.load %arg10[%c24_57, %c32_58] : memref<64x64xf32, #tpu.memory_space<vmem>>, vector<8x32xf32>
    tpu.vector_store %arg10[%c24_57, %c32_58], %325 {strides = array<i32>} : memref<64x64xf32, #tpu.memory_space<vmem>>, vector<8x32xf32>,
    %328 = tpu.concatenate %297, %325 in 1 : vector<8x32xf32>, vector<8x32xf32> -> vector<8x64xf32>
    %cst_59 = arith.constant dense<0.000000e+00> : vector<8x256xf32>
    %329 = tpu.matmul %328, %6, %cst_59 {dimension_numbers = #tpu.dot_dimension_numbers<[1], [0], [0], [1], [0, 0, 1, 1], [], []>} : vector<8x64xf32>, vector<64x256xf32>, vector<8x256xf32> -> vector<8x256xf32>
    %330 = vector.broadcast %7 : vector<1x256xf32> to vector<8x256xf32>
    %331 = arith.addf %329, %330 : vector<8x256xf32>
    %332 = vector.extract_strided_slice %5 {offsets = [40, 0], sizes = [8, 128], strides = [1, 1]} : vector<64x256xf32> to vector<8x128xf32>
    %333 = vector.extract_strided_slice %5 {offsets = [16, 128], sizes = [8, 128], strides = [1, 1]} : vector<64x256xf32> to vector<8x128xf32>
    %334 = vector.extract_strided_slice %331 {offsets = [0, 0], sizes = [8, 128], strides = [1, 1]} : vector<8x256xf32> to vector<8x128xf32>
    %335 = vector.extract_strided_slice %328 {offsets = [0, 0], sizes = [8, 32], strides = [1, 1]} : vector<8x64xf32> to vector<8x32xf32>
    %336 = vector.extract_strided_slice %332 {offsets = [0, 0], sizes = [8, 32], strides = [1, 1]} : vector<8x128xf32> to vector<8x32xf32>
    %337 = vector.extract_strided_slice %334 {offsets = [0, 0], sizes = [8, 32], strides = [1, 1]} : vector<8x128xf32> to vector<8x32xf32>
    %338 = arith.addf %336, %337 : vector<8x32xf32>
    %339 = arith.negf %338 : vector<8x32xf32>
    %340 = math.exp %339 : vector<8x32xf32>
    %cst_60 = arith.constant 1.000000e+00 : f32
    %341 = vector.broadcast %cst_60 : f32 to vector<8x32xf32>
    %342 = arith.addf %341, %340 : vector<8x32xf32>
    %343 = arith.divf %341, %342 : vector<8x32xf32>
    %344 = vector.extract_strided_slice %332 {offsets = [0, 32], sizes = [8, 32], strides = [1, 1]} : vector<8x128xf32> to vector<8x32xf32>
    %345 = vector.extract_strided_slice %334 {offsets = [0, 32], sizes = [8, 32], strides = [1, 1]} : vector<8x128xf32> to vector<8x32xf32>
    %346 = arith.addf %344, %345 : vector<8x32xf32>
    %347 = arith.negf %346 : vector<8x32xf32>
    %348 = math.exp %347 : vector<8x32xf32>
    %cst_61 = arith.constant 1.000000e+00 : f32
    %349 = vector.broadcast %cst_61 : f32 to vector<8x32xf32>
    %350 = arith.addf %349, %348 : vector<8x32xf32>
    %351 = arith.divf %349, %350 : vector<8x32xf32>
    %352 = vector.extract_strided_slice %332 {offsets = [0, 64], sizes = [8, 32], strides = [1, 1]} : vector<8x128xf32> to vector<8x32xf32>
    %353 = vector.extract_strided_slice %334 {offsets = [0, 64], sizes = [8, 32], strides = [1, 1]} : vector<8x128xf32> to vector<8x32xf32>
    %354 = arith.mulf %343, %353 : vector<8x32xf32>
    %355 = arith.addf %352, %354 : vector<8x32xf32>
    %356 = math.tanh %355 : vector<8x32xf32>
    %cst_62 = arith.constant 1.000000e+00 : f32
    %357 = vector.broadcast %cst_62 : f32 to vector<8x32xf32>
    %358 = arith.subf %357, %351 : vector<8x32xf32>
    %359 = arith.mulf %358, %356 : vector<8x32xf32>
    %360 = arith.mulf %351, %335 : vector<8x32xf32>
    %361 = arith.addf %359, %360 : vector<8x32xf32>
    %362 = vector.extract_strided_slice %331 {offsets = [0, 128], sizes = [8, 128], strides = [1, 1]} : vector<8x256xf32> to vector<8x128xf32>
    %363 = vector.extract_strided_slice %328 {offsets = [0, 32], sizes = [8, 32], strides = [1, 1]} : vector<8x64xf32> to vector<8x32xf32>
    %364 = vector.extract_strided_slice %333 {offsets = [0, 0], sizes = [8, 32], strides = [1, 1]} : vector<8x128xf32> to vector<8x32xf32>
    %365 = vector.extract_strided_slice %362 {offsets = [0, 0], sizes = [8, 32], strides = [1, 1]} : vector<8x128xf32> to vector<8x32xf32>
    %366 = arith.addf %364, %365 : vector<8x32xf32>
    %367 = arith.negf %366 : vector<8x32xf32>
    %368 = math.exp %367 : vector<8x32xf32>
    %cst_63 = arith.constant 1.000000e+00 : f32
    %369 = vector.broadcast %cst_63 : f32 to vector<8x32xf32>
    %370 = arith.addf %369, %368 : vector<8x32xf32>
    %371 = arith.divf %369, %370 : vector<8x32xf32>
    %372 = vector.extract_strided_slice %333 {offsets = [0, 32], sizes = [8, 32], strides = [1, 1]} : vector<8x128xf32> to vector<8x32xf32>
    %373 = vector.extract_strided_slice %362 {offsets = [0, 32], sizes = [8, 32], strides = [1, 1]} : vector<8x128xf32> to vector<8x32xf32>
    %374 = arith.addf %372, %373 : vector<8x32xf32>
    %375 = arith.negf %374 : vector<8x32xf32>
    %376 = math.exp %375 : vector<8x32xf32>
    %cst_64 = arith.constant 1.000000e+00 : f32
    %377 = vector.broadcast %cst_64 : f32 to vector<8x32xf32>
    %378 = arith.addf %377, %376 : vector<8x32xf32>
    %379 = arith.divf %377, %378 : vector<8x32xf32>
    %380 = vector.extract_strided_slice %333 {offsets = [0, 64], sizes = [8, 32], strides = [1, 1]} : vector<8x128xf32> to vector<8x32xf32>
    %381 = vector.extract_strided_slice %362 {offsets = [0, 64], sizes = [8, 32], strides = [1, 1]} : vector<8x128xf32> to vector<8x32xf32>
    %382 = arith.mulf %371, %381 : vector<8x32xf32>
    %383 = arith.addf %380, %382 : vector<8x32xf32>
    %384 = math.tanh %383 : vector<8x32xf32>
    %cst_65 = arith.constant 1.000000e+00 : f32
    %385 = vector.broadcast %cst_65 : f32 to vector<8x32xf32>
    %386 = arith.subf %385, %379 : vector<8x32xf32>
    %387 = arith.mulf %386, %384 : vector<8x32xf32>
    %388 = arith.mulf %379, %363 : vector<8x32xf32>
    %389 = arith.addf %387, %388 : vector<8x32xf32>
    %c40_66 = arith.constant 40 : index
    %c0_67 = arith.constant 0 : index
    %390 = vector.load %arg10[%c40_66, %c0_67] : memref<64x64xf32, #tpu.memory_space<vmem>>, vector<8x32xf32>
    tpu.vector_store %arg10[%c40_66, %c0_67], %361 {strides = array<i32>} : memref<64x64xf32, #tpu.memory_space<vmem>>, vector<8x32xf32>,
    %c16_68 = arith.constant 16 : index
    %c32_69 = arith.constant 32 : index
    %391 = vector.load %arg10[%c16_68, %c32_69] : memref<64x64xf32, #tpu.memory_space<vmem>>, vector<8x32xf32>
    tpu.vector_store %arg10[%c16_68, %c32_69], %389 {strides = array<i32>} : memref<64x64xf32, #tpu.memory_space<vmem>>, vector<8x32xf32>,
    %392 = tpu.concatenate %361, %389 in 1 : vector<8x32xf32>, vector<8x32xf32> -> vector<8x64xf32>
    %cst_70 = arith.constant dense<0.000000e+00> : vector<8x256xf32>
    %393 = tpu.matmul %392, %6, %cst_70 {dimension_numbers = #tpu.dot_dimension_numbers<[1], [0], [0], [1], [0, 0, 1, 1], [], []>} : vector<8x64xf32>, vector<64x256xf32>, vector<8x256xf32> -> vector<8x256xf32>
    %394 = vector.broadcast %7 : vector<1x256xf32> to vector<8x256xf32>
    %395 = arith.addf %393, %394 : vector<8x256xf32>
    %396 = vector.extract_strided_slice %5 {offsets = [48, 0], sizes = [8, 128], strides = [1, 1]} : vector<64x256xf32> to vector<8x128xf32>
    %397 = vector.extract_strided_slice %5 {offsets = [8, 128], sizes = [8, 128], strides = [1, 1]} : vector<64x256xf32> to vector<8x128xf32>
    %398 = vector.extract_strided_slice %395 {offsets = [0, 0], sizes = [8, 128], strides = [1, 1]} : vector<8x256xf32> to vector<8x128xf32>
    %399 = vector.extract_strided_slice %392 {offsets = [0, 0], sizes = [8, 32], strides = [1, 1]} : vector<8x64xf32> to vector<8x32xf32>
    %400 = vector.extract_strided_slice %396 {offsets = [0, 0], sizes = [8, 32], strides = [1, 1]} : vector<8x128xf32> to vector<8x32xf32>
    %401 = vector.extract_strided_slice %398 {offsets = [0, 0], sizes = [8, 32], strides = [1, 1]} : vector<8x128xf32> to vector<8x32xf32>
    %402 = arith.addf %400, %401 : vector<8x32xf32>
    %403 = arith.negf %402 : vector<8x32xf32>
    %404 = math.exp %403 : vector<8x32xf32>
    %cst_71 = arith.constant 1.000000e+00 : f32
    %405 = vector.broadcast %cst_71 : f32 to vector<8x32xf32>
    %406 = arith.addf %405, %404 : vector<8x32xf32>
    %407 = arith.divf %405, %406 : vector<8x32xf32>
    %408 = vector.extract_strided_slice %396 {offsets = [0, 32], sizes = [8, 32], strides = [1, 1]} : vector<8x128xf32> to vector<8x32xf32>
    %409 = vector.extract_strided_slice %398 {offsets = [0, 32], sizes = [8, 32], strides = [1, 1]} : vector<8x128xf32> to vector<8x32xf32>
    %410 = arith.addf %408, %409 : vector<8x32xf32>
    %411 = arith.negf %410 : vector<8x32xf32>
    %412 = math.exp %411 : vector<8x32xf32>
    %cst_72 = arith.constant 1.000000e+00 : f32
    %413 = vector.broadcast %cst_72 : f32 to vector<8x32xf32>
    %414 = arith.addf %413, %412 : vector<8x32xf32>
    %415 = arith.divf %413, %414 : vector<8x32xf32>
    %416 = vector.extract_strided_slice %396 {offsets = [0, 64], sizes = [8, 32], strides = [1, 1]} : vector<8x128xf32> to vector<8x32xf32>
    %417 = vector.extract_strided_slice %398 {offsets = [0, 64], sizes = [8, 32], strides = [1, 1]} : vector<8x128xf32> to vector<8x32xf32>
    %418 = arith.mulf %407, %417 : vector<8x32xf32>
    %419 = arith.addf %416, %418 : vector<8x32xf32>
    %420 = math.tanh %419 : vector<8x32xf32>
    %cst_73 = arith.constant 1.000000e+00 : f32
    %421 = vector.broadcast %cst_73 : f32 to vector<8x32xf32>
    %422 = arith.subf %421, %415 : vector<8x32xf32>
    %423 = arith.mulf %422, %420 : vector<8x32xf32>
    %424 = arith.mulf %415, %399 : vector<8x32xf32>
    %425 = arith.addf %423, %424 : vector<8x32xf32>
    %426 = vector.extract_strided_slice %395 {offsets = [0, 128], sizes = [8, 128], strides = [1, 1]} : vector<8x256xf32> to vector<8x128xf32>
    %427 = vector.extract_strided_slice %392 {offsets = [0, 32], sizes = [8, 32], strides = [1, 1]} : vector<8x64xf32> to vector<8x32xf32>
    %428 = vector.extract_strided_slice %397 {offsets = [0, 0], sizes = [8, 32], strides = [1, 1]} : vector<8x128xf32> to vector<8x32xf32>
    %429 = vector.extract_strided_slice %426 {offsets = [0, 0], sizes = [8, 32], strides = [1, 1]} : vector<8x128xf32> to vector<8x32xf32>
    %430 = arith.addf %428, %429 : vector<8x32xf32>
    %431 = arith.negf %430 : vector<8x32xf32>
    %432 = math.exp %431 : vector<8x32xf32>
    %cst_74 = arith.constant 1.000000e+00 : f32
    %433 = vector.broadcast %cst_74 : f32 to vector<8x32xf32>
    %434 = arith.addf %433, %432 : vector<8x32xf32>
    %435 = arith.divf %433, %434 : vector<8x32xf32>
    %436 = vector.extract_strided_slice %397 {offsets = [0, 32], sizes = [8, 32], strides = [1, 1]} : vector<8x128xf32> to vector<8x32xf32>
    %437 = vector.extract_strided_slice %426 {offsets = [0, 32], sizes = [8, 32], strides = [1, 1]} : vector<8x128xf32> to vector<8x32xf32>
    %438 = arith.addf %436, %437 : vector<8x32xf32>
    %439 = arith.negf %438 : vector<8x32xf32>
    %440 = math.exp %439 : vector<8x32xf32>
    %cst_75 = arith.constant 1.000000e+00 : f32
    %441 = vector.broadcast %cst_75 : f32 to vector<8x32xf32>
    %442 = arith.addf %441, %440 : vector<8x32xf32>
    %443 = arith.divf %441, %442 : vector<8x32xf32>
    %444 = vector.extract_strided_slice %397 {offsets = [0, 64], sizes = [8, 32], strides = [1, 1]} : vector<8x128xf32> to vector<8x32xf32>
    %445 = vector.extract_strided_slice %426 {offsets = [0, 64], sizes = [8, 32], strides = [1, 1]} : vector<8x128xf32> to vector<8x32xf32>
    %446 = arith.mulf %435, %445 : vector<8x32xf32>
    %447 = arith.addf %444, %446 : vector<8x32xf32>
    %448 = math.tanh %447 : vector<8x32xf32>
    %cst_76 = arith.constant 1.000000e+00 : f32
    %449 = vector.broadcast %cst_76 : f32 to vector<8x32xf32>
    %450 = arith.subf %449, %443 : vector<8x32xf32>
    %451 = arith.mulf %450, %448 : vector<8x32xf32>
    %452 = arith.mulf %443, %427 : vector<8x32xf32>
    %453 = arith.addf %451, %452 : vector<8x32xf32>
    %c48_77 = arith.constant 48 : index
    %c0_78 = arith.constant 0 : index
    %454 = vector.load %arg10[%c48_77, %c0_78] : memref<64x64xf32, #tpu.memory_space<vmem>>, vector<8x32xf32>
    tpu.vector_store %arg10[%c48_77, %c0_78], %425 {strides = array<i32>} : memref<64x64xf32, #tpu.memory_space<vmem>>, vector<8x32xf32>,
    %c8_79 = arith.constant 8 : index
    %c32_80 = arith.constant 32 : index
    %455 = vector.load %arg10[%c8_79, %c32_80] : memref<64x64xf32, #tpu.memory_space<vmem>>, vector<8x32xf32>
    tpu.vector_store %arg10[%c8_79, %c32_80], %453 {strides = array<i32>} : memref<64x64xf32, #tpu.memory_space<vmem>>, vector<8x32xf32>,
    %456 = tpu.concatenate %425, %453 in 1 : vector<8x32xf32>, vector<8x32xf32> -> vector<8x64xf32>
    %cst_81 = arith.constant dense<0.000000e+00> : vector<8x256xf32>
    %457 = tpu.matmul %456, %6, %cst_81 {dimension_numbers = #tpu.dot_dimension_numbers<[1], [0], [0], [1], [0, 0, 1, 1], [], []>} : vector<8x64xf32>, vector<64x256xf32>, vector<8x256xf32> -> vector<8x256xf32>
    %458 = vector.broadcast %7 : vector<1x256xf32> to vector<8x256xf32>
    %459 = arith.addf %457, %458 : vector<8x256xf32>
    %460 = vector.extract_strided_slice %5 {offsets = [56, 0], sizes = [8, 128], strides = [1, 1]} : vector<64x256xf32> to vector<8x128xf32>
    %461 = vector.extract_strided_slice %5 {offsets = [0, 128], sizes = [8, 128], strides = [1, 1]} : vector<64x256xf32> to vector<8x128xf32>
    %462 = vector.extract_strided_slice %459 {offsets = [0, 0], sizes = [8, 128], strides = [1, 1]} : vector<8x256xf32> to vector<8x128xf32>
    %463 = vector.extract_strided_slice %456 {offsets = [0, 0], sizes = [8, 32], strides = [1, 1]} : vector<8x64xf32> to vector<8x32xf32>
    %464 = vector.extract_strided_slice %460 {offsets = [0, 0], sizes = [8, 32], strides = [1, 1]} : vector<8x128xf32> to vector<8x32xf32>
    %465 = vector.extract_strided_slice %462 {offsets = [0, 0], sizes = [8, 32], strides = [1, 1]} : vector<8x128xf32> to vector<8x32xf32>
    %466 = arith.addf %464, %465 : vector<8x32xf32>
    %467 = arith.negf %466 : vector<8x32xf32>
    %468 = math.exp %467 : vector<8x32xf32>
    %cst_82 = arith.constant 1.000000e+00 : f32
    %469 = vector.broadcast %cst_82 : f32 to vector<8x32xf32>
    %470 = arith.addf %469, %468 : vector<8x32xf32>
    %471 = arith.divf %469, %470 : vector<8x32xf32>
    %472 = vector.extract_strided_slice %460 {offsets = [0, 32], sizes = [8, 32], strides = [1, 1]} : vector<8x128xf32> to vector<8x32xf32>
    %473 = vector.extract_strided_slice %462 {offsets = [0, 32], sizes = [8, 32], strides = [1, 1]} : vector<8x128xf32> to vector<8x32xf32>
    %474 = arith.addf %472, %473 : vector<8x32xf32>
    %475 = arith.negf %474 : vector<8x32xf32>
    %476 = math.exp %475 : vector<8x32xf32>
    %cst_83 = arith.constant 1.000000e+00 : f32
    %477 = vector.broadcast %cst_83 : f32 to vector<8x32xf32>
    %478 = arith.addf %477, %476 : vector<8x32xf32>
    %479 = arith.divf %477, %478 : vector<8x32xf32>
    %480 = vector.extract_strided_slice %460 {offsets = [0, 64], sizes = [8, 32], strides = [1, 1]} : vector<8x128xf32> to vector<8x32xf32>
    %481 = vector.extract_strided_slice %462 {offsets = [0, 64], sizes = [8, 32], strides = [1, 1]} : vector<8x128xf32> to vector<8x32xf32>
    %482 = arith.mulf %471, %481 : vector<8x32xf32>
    %483 = arith.addf %480, %482 : vector<8x32xf32>
    %484 = math.tanh %483 : vector<8x32xf32>
    %cst_84 = arith.constant 1.000000e+00 : f32
    %485 = vector.broadcast %cst_84 : f32 to vector<8x32xf32>
    %486 = arith.subf %485, %479 : vector<8x32xf32>
    %487 = arith.mulf %486, %484 : vector<8x32xf32>
    %488 = arith.mulf %479, %463 : vector<8x32xf32>
    %489 = arith.addf %487, %488 : vector<8x32xf32>
    %490 = vector.extract_strided_slice %459 {offsets = [0, 128], sizes = [8, 128], strides = [1, 1]} : vector<8x256xf32> to vector<8x128xf32>
    %491 = vector.extract_strided_slice %456 {offsets = [0, 32], sizes = [8, 32], strides = [1, 1]} : vector<8x64xf32> to vector<8x32xf32>
    %492 = vector.extract_strided_slice %461 {offsets = [0, 0], sizes = [8, 32], strides = [1, 1]} : vector<8x128xf32> to vector<8x32xf32>
    %493 = vector.extract_strided_slice %490 {offsets = [0, 0], sizes = [8, 32], strides = [1, 1]} : vector<8x128xf32> to vector<8x32xf32>
    %494 = arith.addf %492, %493 : vector<8x32xf32>
    %495 = arith.negf %494 : vector<8x32xf32>
    %496 = math.exp %495 : vector<8x32xf32>
    %cst_85 = arith.constant 1.000000e+00 : f32
    %497 = vector.broadcast %cst_85 : f32 to vector<8x32xf32>
    %498 = arith.addf %497, %496 : vector<8x32xf32>
    %499 = arith.divf %497, %498 : vector<8x32xf32>
    %500 = vector.extract_strided_slice %461 {offsets = [0, 32], sizes = [8, 32], strides = [1, 1]} : vector<8x128xf32> to vector<8x32xf32>
    %501 = vector.extract_strided_slice %490 {offsets = [0, 32], sizes = [8, 32], strides = [1, 1]} : vector<8x128xf32> to vector<8x32xf32>
    %502 = arith.addf %500, %501 : vector<8x32xf32>
    %503 = arith.negf %502 : vector<8x32xf32>
    %504 = math.exp %503 : vector<8x32xf32>
    %cst_86 = arith.constant 1.000000e+00 : f32
    %505 = vector.broadcast %cst_86 : f32 to vector<8x32xf32>
    %506 = arith.addf %505, %504 : vector<8x32xf32>
    %507 = arith.divf %505, %506 : vector<8x32xf32>
    %508 = vector.extract_strided_slice %461 {offsets = [0, 64], sizes = [8, 32], strides = [1, 1]} : vector<8x128xf32> to vector<8x32xf32>
    %509 = vector.extract_strided_slice %490 {offsets = [0, 64], sizes = [8, 32], strides = [1, 1]} : vector<8x128xf32> to vector<8x32xf32>
    %510 = arith.mulf %499, %509 : vector<8x32xf32>
    %511 = arith.addf %508, %510 : vector<8x32xf32>
    %512 = math.tanh %511 : vector<8x32xf32>
    %cst_87 = arith.constant 1.000000e+00 : f32
    %513 = vector.broadcast %cst_87 : f32 to vector<8x32xf32>
    %514 = arith.subf %513, %507 : vector<8x32xf32>
    %515 = arith.mulf %514, %512 : vector<8x32xf32>
    %516 = arith.mulf %507, %491 : vector<8x32xf32>
    %517 = arith.addf %515, %516 : vector<8x32xf32>
    %c56_88 = arith.constant 56 : index
    %c0_89 = arith.constant 0 : index
    %518 = vector.load %arg10[%c56_88, %c0_89] : memref<64x64xf32, #tpu.memory_space<vmem>>, vector<8x32xf32>
    tpu.vector_store %arg10[%c56_88, %c0_89], %489 {strides = array<i32>} : memref<64x64xf32, #tpu.memory_space<vmem>>, vector<8x32xf32>,
    %c0_90 = arith.constant 0 : index
    %c32_91 = arith.constant 32 : index
    %519 = vector.load %arg10[%c0_90, %c32_91] : memref<64x64xf32, #tpu.memory_space<vmem>>, vector<8x32xf32>
    tpu.vector_store %arg10[%c0_90, %c32_91], %517 {strides = array<i32>} : memref<64x64xf32, #tpu.memory_space<vmem>>, vector<8x32xf32>,
    %c0_92 = arith.constant 0 : index
    %c0_93 = arith.constant 0 : index
    %520 = vector.load %arg10[%c0_92, %c0_93] : memref<64x64xf32, #tpu.memory_space<vmem>>, vector<64x64xf32>
    %c0_94 = arith.constant 0 : index
    %c0_95 = arith.constant 0 : index
    %521 = vector.load %arg7[%c0_94, %c0_95] : memref<64x128xf32, #tpu.memory_space<vmem>>, vector<64x128xf32>
    %cst_96 = arith.constant dense<0.000000e+00> : vector<64x128xf32>
    %522 = tpu.matmul %520, %521, %cst_96 {dimension_numbers = #tpu.dot_dimension_numbers<[1], [0], [0], [1], [0, 0, 1, 1], [], []>} : vector<64x64xf32>, vector<64x128xf32>, vector<64x128xf32> -> vector<64x128xf32>
    %c0_97 = arith.constant 0 : index
    %c0_98 = arith.constant 0 : index
    %523 = vector.load %arg8[%c0_97, %c0_98] : memref<1x128xf32, #tpu.memory_space<vmem>>, vector<1x128xf32>
    %524 = vector.broadcast %523 : vector<1x128xf32> to vector<64x128xf32>
    %525 = arith.addf %522, %524 : vector<64x128xf32>
    %c0_99 = arith.constant 0 : index
    %c0_100 = arith.constant 0 : index
    %526 = vector.load %arg9[%c0_99, %c0_100] : memref<64x128xf32, #tpu.memory_space<vmem>>, vector<64x128xf32>
    tpu.vector_store %arg9[%c0_99, %c0_100], %525 {strides = array<i32>} : memref<64x128xf32, #tpu.memory_space<vmem>>, vector<64x128xf32>,
    return
  }
  func.func @transform_0(%arg0: i32) -> (i32, i32) {
    %c0_i32 = arith.constant 0 : i32
    %c0_i32_0 = arith.constant 0 : i32
    return %arg0, %c0_i32 : i32, i32
  }
  func.func @transform_1(%arg0: i32) -> (i32, i32) {
    %c0_i32 = arith.constant 0 : i32
    %c0_i32_0 = arith.constant 0 : i32
    return %arg0, %c0_i32 : i32, i32
  }
  func.func @transform_2(%arg0: i32) -> (i32, i32) {
    %c0_i32 = arith.constant 0 : i32
    %c0_i32_0 = arith.constant 0 : i32
    %c0_i32_1 = arith.constant 0 : i32
    return %c0_i32, %c0_i32_0 : i32, i32
  }
  func.func @transform_3(%arg0: i32) -> (i32, i32) {
    %c0_i32 = arith.constant 0 : i32
    %c0_i32_0 = arith.constant 0 : i32
    %c0_i32_1 = arith.constant 0 : i32
    return %c0_i32, %c0_i32_0 : i32, i32
  }
  func.func @transform_4(%arg0: i32) -> (i32, i32) {
    %c0_i32 = arith.constant 0 : i32
    %c0_i32_0 = arith.constant 0 : i32
    %c0_i32_1 = arith.constant 0 : i32
    return %c0_i32, %c0_i32_0 : i32, i32
  }
  func.func @transform_5(%arg0: i32) -> (i32, i32) {
    %c0_i32 = arith.constant 0 : i32
    %c0_i32_0 = arith.constant 0 : i32
    %c0_i32_1 = arith.constant 0 : i32
    return %c0_i32, %c0_i32_0 : i32, i32
  }
  func.func @transform_6(%arg0: i32) -> (i32, i32) {
    %c0_i32 = arith.constant 0 : i32
    %c0_i32_0 = arith.constant 0 : i32
    %c0_i32_1 = arith.constant 0 : i32
    return %c0_i32, %c0_i32_0 : i32, i32
  }
  func.func @transform_7(%arg0: i32) -> (i32, i32) {
    %c0_i32 = arith.constant 0 : i32
    %c0_i32_0 = arith.constant 0 : i32
    %c0_i32_1 = arith.constant 0 : i32
    return %c0_i32, %c0_i32_0 : i32, i32
  }
  func.func @transform_8(%arg0: i32) -> (i32, i32) {
    %c0_i32 = arith.constant 0 : i32
    %c0_i32_0 = arith.constant 0 : i32
    return %arg0, %c0_i32 : i32, i32
  }
}

</mosaic_0001>

<bundles_post_ra>
// kernel: squeeze.2
= control target key start
LH: loop header
LB: loop body
LE: loop exit
PB: predicated region body
PF: predicated region fallthrough
CT: control target
= control target key end

     0   :  { %vm3_vm0 = vcmask 261120   ;;  %s13_s11 = smov 96   ;;  %s36_s0 = inlined_call_operand.vmem [shape: f32[5,64], index: 0, kind: input, shape index: {}]   ;;  %s37_s1 = inlined_call_operand.vmem [shape: f32[10,32], index: 1, kind: output, shape index: {}]  }
   0x1   :  { %v2_v0 = vld [vmem:[%s36_s0] sm:$0x1f]  }
   0x2   :  { %v5_v1 = vld [vmem:[%s36_s0] sm:$0x1f]   ;;  %4 = vst.msk [vmem:[%s37_s1] ss:$2 sm:$0x1f] %vm3_vm0, %v2_v0  }
   0x3   :  { %6 = vrot.lane.b32.xlu0 %v5_v1, %s13_s11 }
  0x75   :  { %v7_v2 = vpop.permute.xlu0 %6  }
  0x76   :  { %11 = vst.msk [vmem:[%s37_s1 + $0x1] ss:$2 sm:$0x1f] %vm3_vm0, %v7_v2  }

// kernel: decoder_forward.1
= control target key start
LH: loop header
LB: loop body
LE: loop exit
PB: predicated region body
PF: predicated region fallthrough
CT: control target
= control target key end

     0   :  { %s1921_s27 = smov 0   ;;  %s2493_s0 = inlined_call_operand.vmem [shape: f32[16,64], index: 0, kind: input, shape index: {}]   ;;  %s2494_s1 = inlined_call_operand.vmem [shape: f32[128,16], index: 1, kind: input, shape index: {}]   ;;  %s2495_s2 = inlined_call_operand.vmem [shape: f32[16,256], index: 2, kind: input, shape index: {}]   ;;  %s2496_s3 = inlined_call_operand.vmem [shape: f32[1,256], index: 3, kind: input, shape index: {}]   ;;  %s2497_s4 = inlined_call_operand.vmem [shape: f32[64,256], index: 4, kind: input, shape index: {}]   ;;  %s2498_s5 = inlined_call_operand.vmem [shape: f32[1,256], index: 5, kind: input, shape index: {}]   ;;  %s2499_s6 = inlined_call_operand.vmem [shape: f32[64,128], index: 6, kind: input, shape index: {}]   ;;  %s2500_s7 = inlined_call_operand.vmem [shape: f32[1,128], index: 7, kind: input, shape index: {}]   ;;  %s2501_s8 = inlined_call_operand.vmem [shape: f32[128,128], index: 8, kind: output, shape index: {}]  }
   0x1 LB: > { %s1927_s28 = sadd.s32 4294967295, %s1871_s27   ;;  %p1689_p0 = scmp.ge.s32.totalorder %s1871_s27, 1  ;;  %s1871_s27 = sphi %s1921_s27, %s18_s27  }
   0x2   : > { %p272_p1 = scmp.lt.s32.totalorder %s1871_s27, 3 }
   0x4   : > { %p273_p2 = pnand %p1689_p0, %p272_p1 }
   0x5   : > { %s1691_s11 = sshll.u32 (!%p273_p2), %s1927_s28, 3  ;;  %p310_p4 = scmp.lt.s32.totalorder (!%p273_p2), %s1927_s28, 1 }
   0x6   : > { %276 = sbr.rel (%p273_p2) target bundleno = 4818 (0x12d2), region = 52  ;;  %p315_p3 = scmp.lt.s32.totalorder (!%p273_p2), %s1691_s11, 15 }
   0x7   : > { %s1873_s23 = smov (!%p273_p2), 64   ;;  %s1874_s24 = smov (!%p273_p2), 96  }
   0x8   : > { %s1875_s26 = smov (!%p273_p2), 32  }
   0xb   : > { %v336_v0 = vld [vmem:[%s2495_s2 + $0x10] sm:$0xff]  ;;  %v334_v1 = vld [vmem:[%s2495_s2] sm:$0xff]  ;;  %v1946_v3 = vld [vmem:[%s2497_s4 + $0x78] sm:$0xff]  ;;  %s2503_s11 = smov (!%p315_p3, %s1691_s11), 15  ;;  %vm344_vm0 = vcmask 130048   ;;  %s2505_s28 = smov (!%p310_p4, %s1927_s28), 1 }
   0xc   : > { %1753 = vmatpush.msra.mxu2 %v336_v0  ;;  %v1941_v2 = vld [vmem:[%s2497_s4 + $0x70] sm:$0xff]  ;;  %1754 = vmatpush.msra.mxu3 %v336_v0  ;;  %v1954_v4 = vld [vmem:[%s2497_s4 + $0x60] sm:$0xff]  ;;  %v1959_v5 = vld [vmem:[%s2497_s4 + $0x68] sm:$0xff]  ;;  %s1692_s20 = sshll.u32 %s2503_s11, 3  ;;  %s1690_s16 = sshll.u32 %s2505_s28, 3  ;;  %vm474_vm1 = vcmask 523264  }
   0xd   : > { %383 = vmatpush.msra.mxu1 %v336_v0  ;;  %1012 = vmatpush.msra.mxu0 %v1941_v2  ;;  %v1967_v6 = vld [vmem:[%s2497_s4 + $0x58] sm:$0xff]  ;;  %s1975_s25 = scalar_lea.vmem %s2494_s1, %s1692_s20  ;;  %v1981_v7 = vld [vmem:[%s2497_s4 + $0x50] sm:$0xff]  ;;  %v1993_v10 = vld [vmem:[%s2497_s4 + $0x40] sm:$0xff]  ;;  %s313_s19 = scalar_lea.vmem %s2493_s0, %s1690_s16  ;;  %vm605_vm10 = vcmask 523520   ;;  %vm603_vm11 = vcmask 261120  }
   0xe   : > { %1755 = vmatpush.msra.mxu2 %v334_v1  ;;  %1756 = vmatpush.msra.mxu3 %v334_v1  ;;  %v337_v8 = vld [vmem:[%s2495_s2 + $0x18] sm:$0xff]  ;;  %v1998_v11 = vld [vmem:[%s2497_s4 + $0x48] sm:$0xff]  ;;  %v2004_v12 = vld [vmem:[%s1975_s25 + $0x30] sm:$0xff]  ;;  %s324_s30 = scalar_lea.vmem %s2501_s8, %s1692_s20 }
   0xf   : > { %384 = vmatpush.msra.mxu1 %v334_v1  ;;  %1013 = vmatpush.msra.mxu0 %v1954_v4  ;;  %v1988_v9 = vld [vmem:[%s1975_s25 + $0x18] sm:$0xff]  ;;  %v2008_v13 = vld [vmem:[%s1975_s25] sm:$0xff]  ;;  %v335_v14 = vld [vmem:[%s2495_s2 + $0x8] sm:$0xff] }
  0x10   : > { %486 = vmatpush.msrb.mxu2 %v1941_v2  ;;  %506 = vmatpush.msrb.mxu3 %v1946_v3  ;;  %v2019_v15 = vld [vmem:[%s2497_s4 + $0x38] sm:$0xff]  ;;  %v2024_v16 = vld [vmem:[%s2497_s4 + $0x30] sm:$0xff]  ;;  %v2034_v17 = vld [vmem:[%s2497_s4 + $0x28] sm:$0xff] }
  0x11   : > { %424 = vmatpush.msrb.mxu1 %v337_v8  ;;  %1014 = vmatpush.msra.mxu0 %v1981_v7  ;;  %v2039_v18 = vld [vmem:[%s2497_s4 + $0x20] sm:$0xff]  ;;  %v2050_v20 = vld [vmem:[%s2497_s4 + $0x18] sm:$0xff]  ;;  %v2056_v21 = vld [vmem:[%s2497_s4 + $0x10] sm:$0xff] }
  0x12   : > { %487 = vmatpush.msrb.mxu2 %v1954_v4  ;;  %507 = vmatpush.msrb.mxu3 %v1959_v5  ;;  %v2044_v19 = vld [vmem:[%s1975_s25 + $0x20] sm:$0xff]  ;;  %v2059_v22 = vld [vmem:[%s1975_s25 + $0x38] sm:$0xff]  ;;  %v2070_v23 = vld [vmem:[%s2497_s4 + $0x8] sm:$0xff] }
  0x13   : > { %1698 = vmatmul.msk.f32.vlgmr.msra.gmra.mxu2 %vm344_vm0, %v1988_v9  ;;  %1701 = vmatmul.msk.f32.vlgmr.msra.gmra.mxu3 %vm344_vm0, %v2004_v12  ;;  %v327_v24 = vld [vmem:[%s1975_s25 + $0x8] sm:$0xff]  ;;  %v2079_v25 = vld [vmem:[%s2497_s4] sm:$0xff]  ;;  %v328_v27 = vld [vmem:[%s1975_s25 + $0x10] sm:$0xff] }
  0x14   : > { %508 = vmatpush.msrb.mxu3 %v1967_v6  ;;  %488 = vmatpush.msrb.mxu2 %v1981_v7  ;;  %v2092_v26 = vld [vmem:[%s1975_s25 + $0x28] sm:$0xff]  ;;  %v2106_v28 = vld [vmem:[%s313_s19] sm:$0xff] }
  0x15   : > { %1695 = vmatmul.msk.f32.vlgmr.msra.gmra.mxu1 %vm344_vm0, %v2008_v13  ;;  %1015 = vmatpush.msra.mxu0 %v1993_v10  ;;  %v338_v29 = vld [vmem:[%s2496_s3] sm:$0x3] }
  0x16   : > { %509 = vmatpush.msrb.mxu3 %v1998_v11  ;;  %489 = vmatpush.msrb.mxu2 %v1993_v10  ;;  %v340_v30 = vperm.slane %v338_v29, 0  ;;  %v467_v46 = vld [vmem:[%s2498_s5] sm:$0x3]  ;;  %v341_v48 = vperm.slane %v338_v29, 1 }
  0x17   : > { %425 = vmatpush.msrb.mxu1 %v335_v14  ;;  %1016 = vmatpush.msra.mxu0 %v2024_v16  ;;  %v2195_v47 = vperm.slane %v467_v46, 0  ;;  %v2201_v53 = vperm.slane %v467_v46, 1 }
  0x18   : > { %510 = vmatpush.msrb.mxu3 %v2019_v15  ;;  %490 = vmatpush.msrb.mxu2 %v2024_v16 }
  0x19   : > { %1032 = vmatpush.msra.mxu1 %v1946_v3  ;;  %1017 = vmatpush.msra.mxu0 %v2039_v18 }
  0x1a   : > { %511 = vmatpush.msrb.mxu3 %v2034_v17  ;;  %491 = vmatpush.msrb.mxu2 %v2039_v18 }
  0x1b   : > { %1033 = vmatpush.msra.mxu1 %v1959_v5  ;;  %1699 = vmatmul.msk.f32.gmra.mxu2 %vm344_vm0, %v2044_v19 }
  0x1c   : > { %512 = vmatpush.msrb.mxu3 %v2050_v20  ;;  %492 = vmatpush.msrb.mxu2 %v2056_v21 }
  0x1d   : > { %1702 = vmatmul.msk.f32.gmra.mxu3 %vm344_vm0, %v2059_v22  ;;  %1696 = vmatmul.msk.f32.gmra.mxu1 %vm344_vm0, %v327_v24 }
  0x1e   : > { %513 = vmatpush.msrb.mxu3 %v2070_v23  ;;  %493 = vmatpush.msrb.mxu2 %v2079_v25 }
  0x1f   : > { %1034 = vmatpush.msra.mxu1 %v1967_v6  ;;  %1018 = vmatpush.msra.mxu0 %v2056_v21 }
  0x20   : > { %639 = vmatpush.msra.mxu3 %v1946_v3  ;;  %619 = vmatpush.msra.mxu2 %v1941_v2 }
  0x21   : > { %1035 = vmatpush.msra.mxu1 %v1998_v11  ;;  %1019 = vmatpush.msra.mxu0 %v2079_v25 }
  0x22   : > { %640 = vmatpush.msra.mxu3 %v1959_v5  ;;  %620 = vmatpush.msra.mxu2 %v1954_v4 }
  0x23   : > { %1700 = vmatmul.msk.f32.gmra.mxu2 %vm344_vm0, %v2092_v26  ;;  %1036 = vmatpush.msra.mxu1 %v2019_v15 }
  0x24   : > { %641 = vmatpush.msra.mxu3 %v1967_v6  ;;  %621 = vmatpush.msra.mxu2 %v1981_v7 }
  0x25   : > { %1712 = vmatmul.msk.f32.vlgmr.msrb.gmra.mxu3 %vm474_vm1, %v2106_v28  ;;  %1697 = vmatmul.msk.f32.gmra.mxu1 %vm344_vm0, %v328_v27 }
  0x26   : > { %642 = vmatpush.msra.mxu3 %v1998_v11  ;;  %622 = vmatpush.msra.mxu2 %v1993_v10 }
  0x27   : > { %1037 = vmatpush.msra.mxu1 %v2034_v17  ;;  %1274 = vmatpush.msrb.mxu0 %v1941_v2 }
  0x28   : > { %643 = vmatpush.msra.mxu3 %v2019_v15  ;;  %623 = vmatpush.msra.mxu2 %v2024_v16 }
  0x29   : > { %1038 = vmatpush.msra.mxu1 %v2050_v20  ;;  %1275 = vmatpush.msrb.mxu0 %v1954_v4 }
  0x2a   : > { %644 = vmatpush.msra.mxu3 %v2034_v17  ;;  %624 = vmatpush.msra.mxu2 %v2039_v18 }
  0x2b   : > { %1039 = vmatpush.msra.mxu1 %v2070_v23  ;;  %1711 = vmatmul.msk.f32.vlgmr.msrb.gmra.mxu2 %vm474_vm1, %v2106_v28 }
  0x2c   : > { %645 = vmatpush.msra.mxu3 %v2050_v20  ;;  %625 = vmatpush.msra.mxu2 %v2056_v21 }
  0x2d   : > { %1703 = vmatmul.msk.f32.vlgmr.msrb.gmra.mxu1 %vm344_vm0, %v2008_v13  ;;  %1276 = vmatpush.msrb.mxu0 %v1981_v7 }
  0x2e   : > { %646 = vmatpush.msra.mxu3 %v2070_v23  ;;  %626 = vmatpush.msra.mxu2 %v2079_v25 }
  0x2f   : > { %1294 = vmatpush.msrb.mxu1 %v1946_v3  ;;  %1277 = vmatpush.msrb.mxu0 %v1993_v10 }
  0x30   : > { %770 = vmatpush.msrb.mxu3 %v1946_v3  ;;  %750 = vmatpush.msrb.mxu2 %v1941_v2 }
  0x31   : > { %1295 = vmatpush.msrb.mxu1 %v1959_v5  ;;  %1278 = vmatpush.msrb.mxu0 %v2024_v16 }
  0x32   : > { %771 = vmatpush.msrb.mxu3 %v1959_v5  ;;  %751 = vmatpush.msrb.mxu2 %v1954_v4 }
  0x33   : > { %1296 = vmatpush.msrb.mxu1 %v1967_v6  ;;  %1279 = vmatpush.msrb.mxu0 %v2039_v18 }
  0x34   : > { %772 = vmatpush.msrb.mxu3 %v1967_v6  ;;  %752 = vmatpush.msrb.mxu2 %v1981_v7 }
  0x35   : > { %1704 = vmatmul.msk.f32.gmra.mxu1 %vm344_vm0, %v327_v24  ;;  %1280 = vmatpush.msrb.mxu0 %v2056_v21 }
  0x36   : > { %773 = vmatpush.msrb.mxu3 %v1998_v11  ;;  %753 = vmatpush.msrb.mxu2 %v1993_v10 }
  0x37   : > { %1297 = vmatpush.msrb.mxu1 %v1998_v11  ;;  %1281 = vmatpush.msrb.mxu0 %v2079_v25 }
  0x38   : > { %774 = vmatpush.msrb.mxu3 %v2019_v15  ;;  %754 = vmatpush.msrb.mxu2 %v2024_v16 }
  0x39   : > { %1298 = vmatpush.msrb.mxu1 %v2019_v15 }
  0x3a   : > { %775 = vmatpush.msrb.mxu3 %v2034_v17  ;;  %755 = vmatpush.msrb.mxu2 %v2039_v18 }
  0x3b   : > { %1299 = vmatpush.msrb.mxu1 %v2034_v17 }
  0x3c   : > { %776 = vmatpush.msrb.mxu3 %v2050_v20  ;;  %756 = vmatpush.msrb.mxu2 %v2056_v21 }
  0x3d   : > { %1300 = vmatpush.msrb.mxu1 %v2050_v20 }
  0x3e   : > { %777 = vmatpush.msrb.mxu3 %v2070_v23  ;;  %1705 = vmatmul.msk.f32.gmra.mxu1 %vm344_vm0, %v328_v27 }
  0x3f   : > { %757 = vmatpush.msrb.mxu2 %v2079_v25  ;;  %1301 = vmatpush.msrb.mxu1 %v2070_v23 }
  0x46   : > { %1706 = vmatmul.msk.f32.gmra.mxu1 %vm344_vm0, %v1988_v9 }
  0x4e   : > { %1707 = vmatmul.msk.f32.gmra.mxu1 %vm344_vm0, %v2044_v19 }
  0x56   : > { %1708 = vmatmul.msk.f32.gmra.mxu1 %vm344_vm0, %v2092_v26 }
  0x5e   : > { %1709 = vmatmul.msk.f32.gmra.mxu1 %vm344_vm0, %v2004_v12 }
  0x66   : > { %1710 = vmatmul.msk.f32.gmra.mxu1 %vm344_vm0, %v2059_v22 }
  0x92   : > { %v386_v31 = vpop.f32.mrf.mxu1 }
  0x93   : > { %v387_v12 = vadd.f32 %v386_v31, %v340_v30 }
  0x96   : > { %v395_v32 = vpop.f32.mrf.mxu2  ;;  %v404_v34 = vpop.f32.mrf.mxu3 }
  0x97   : > { %v2178_v33 = vadd.f32 %v395_v32, %v340_v30  ;;  %v2180_v35 = vadd.f32 %v404_v34, %v340_v30 }
  0x9a   : > { %v389_v36 = vpop.f32.mrf.mxu1 }
  0x9b   : > { %v2182_v38 = vadd.f32 %v389_v36, %v340_v30 }
  0x9e   : > { %v398_v37 = vpop.f32.mrf.mxu2 }
  0x9f   : > { %v2184_v39 = vadd.f32 %v398_v37, %v340_v30 }
  0xa0   : > { %v407_v40 = vpop.f32.mrf.mxu3 }
  0xa1   : > { %v2186_v41 = vadd.f32 %v407_v40, %v340_v30 }
  0xa2   : > { %v392_v42 = vpop.f32.mrf.mxu1 }
  0xa3   : > { %v2188_v43 = vadd.f32 %v392_v42, %v340_v30 }
  0xa6   : > { %v401_v44 = vpop.f32.mrf.mxu2 }
  0xa7   : > { %v2190_v45 = vadd.f32 %v401_v44, %v340_v30 }
  0xa8   : > { %v515_v54 = vpop.f32.mrf.mxu3 }
  0xa9   : > { %v516_v56 = vadd.f32 %v515_v54, %v2201_v53 }
  0xaa   : > { %v427_v49 = vpop.f32.mrf.mxu1 }
  0xab   : > { %v2197_v50 = vadd.f32 %v427_v49, %v341_v48 }
  0xae   : > { %v495_v51 = vpop.f32.mrf.mxu2 }
  0xaf   : > { %v496_v52 = vadd.f32 %v495_v51, %v2195_v47 }
  0xb1   : > { %539 = vrot.lane.b32.xlu0 %v496_v52, %s1873_s23  ;;  %v518_v13 = vadd.f32 %v496_v52, %v387_v12 }
  0xb2   : > { %v430_v55 = vpop.f32.mrf.mxu1 }
  0xb3   : > { %v2204_v57 = vadd.f32 %v430_v55, %v341_v48  ;;  %v1713_v19 = vmul.f32 -1.442695, %v518_v13 }
  0xb5   : > { %1769 = vpow2.f32 %v1713_v19 }
  0xb9   : > { %581 = vrot.lane.b32.xlu0 %v516_v56, %s1873_s23 }
  0xbb   : > { %v433_v58 = vpop.f32.mrf.mxu1  ;;  %v1770_v27 = vpop.eup %1769 }
  0xbc   : > { %v2207_v59 = vadd.f32 %v433_v58, %v341_v48  ;;  %v522_v29 = vadd.f32 1.0, %v1770_v27 }
  0xbe   : > { %vm528_vm3 = vweird.f32 %v522_v29  ;;  %v532_v49 = vand.u32 2147483647, %v522_v29 }
  0xc0   : > { %vm533_vm5 = vcmp.eq.f32.partialorder %v532_v49, 8.507059e+37 }
  0xc3   : > { %v436_v60 = vpop.f32.mrf.mxu1 }
  0xc4   : > { %v2209_v61 = vadd.f32 %v436_v60, %v341_v48 }
  0xcb   : > { %v439_v62 = vpop.f32.mrf.mxu1 }
  0xcc   : > { %v2211_v63 = vadd.f32 %v439_v62, %v341_v48 }
  0xd3   : > { %v442_v0 = vpop.f32.mrf.mxu1 }
  0xd4   : > { %v2213_v1 = vadd.f32 %v442_v0, %v341_v48 }
  0xdb   : > { %v445_v8 = vpop.f32.mrf.mxu1 }
  0xdc   : > { %v2215_v9 = vadd.f32 %v445_v8, %v341_v48 }
  0xe3   : > { %v448_v14 = vpop.f32.mrf.mxu1 }
  0xe4   : > { %v449_v22 = vadd.f32 %v448_v14, %v341_v48  ;;  %v534_v48 = vand.u32 2147483648, %v522_v29 }
  0xe6   : > { %v560_v24 = vadd.f32 %v516_v56, %v449_v22  ;;  %v535_v54 = vor.u32 1.1754944e-38, %v534_v48 }
  0xe8   : > { %v1714_v26 = vmul.f32 -1.442695, %v560_v24 }
  0xea   : > { %1771 = vpow2.f32 %v1714_v26 }
  0xeb   : > { %1773 = vrcp.f32 %v522_v29 }
  0xf0   : > { %v1772_v32 = vpop.eup %1771 }
  0xf1   : > { %v564_v34 = vadd.f32 1.0, %v1772_v32  ;;  %v1774_v36 = vpop.eup %1773 }
  0xf2   : > { %v524_v37 = vmul.f32 %v1774_v36, %v522_v29  ;;  %vm529_vm2 = vweird.f32 %v1774_v36 }
  0xf3   : > { %1775 = vrcp.f32 %v564_v34  ;;  %vm530_vm4 = vmor %vm528_vm3, %vm529_vm2  ;;  %vm570_vm6 = vweird.f32 %v564_v34  ;;  %v576_v58 = vand.u32 2147483648, %v564_v34  ;;  %v574_v0 = vand.u32 2147483647, %v564_v34 }
  0xf4   : > { %v525_v40 = vsub.f32 1.0, %v524_v37 }
  0xf5   : > { %v577_v8 = vor.u32 1.1754944e-38, %v576_v58  ;;  %vm575_vm9 = vcmp.eq.f32.partialorder %v574_v0, 8.507059e+37 }
  0xf6   : > { %v526_v44 = vmul.f32 %v1774_v36, %v525_v40 }
  0xf8   : > { %v527_v31 = vadd.f32 %v1774_v36, %v526_v44 }
  0xf9   : > { %v1776_v42 = vpop.eup %1775 }
  0xfa   : > { %v566_v30 = vmul.f32 %v1776_v42, %v564_v34  ;;  %v531_v51 = vsel %vm530_vm4, %v1774_v36, %v527_v31  ;;  %vm571_vm7 = vweird.f32 %v1776_v42 }
  0xfb   : > { %v536_v56 = vsel %vm533_vm5, %v535_v54, %v531_v51  ;;  %vm572_vm8 = vmor %vm570_vm6, %vm571_vm7 }
  0xfc   : > { %v567_v46 = vsub.f32 1.0, %v566_v30  ;;  %v549_v40 = vsub.f32 1.0, %v536_v56 }
  0xfe   : > { %v568_v52 = vmul.f32 %v1776_v42, %v567_v46 }
 0x100   : > { %v569_v62 = vadd.f32 %v1776_v42, %v568_v52 }
 0x102   : > { %v573_v13 = vsel %vm572_vm8, %v1776_v42, %v569_v62 }
 0x103   : > { %v578_v14 = vsel %vm575_vm9, %v577_v8, %v573_v13 }
 0x104   : > { %v597_v46 = vmul.f32 %v578_v14, %v2106_v28 }
 0x123   : > { %v540_v55 = vpop.permute.xlu0 %539 }
 0x124   : > { %v542_v60 = vmul.f32 %v540_v55, %v536_v56 }
 0x126   : > { %544 = vrot.lane.b32.xlu1 %v542_v60, %s1873_s23 }
 0x12b   : > { %v582_v19 = vpop.permute.xlu0 %581 }
 0x12c   : > { %v584_v24 = vmul.f32 %v582_v19, %v578_v14 }
 0x12e   : > { %586 = vrot.lane.b32.xlu1 %v584_v24, %s1873_s23 }
 0x198   : > { %v545_v26 = vpop.permute.xlu1 %544 }
 0x199   : > { %v547_v27 = vadd.f32 %v545_v26, %v387_v12 }
 0x19b   : > { %1777 = vtanh.f32 %v547_v27 }
 0x1a0   : > { %v587_v29 = vpop.permute.xlu1 %586 }
 0x1a1   : > { %v1778_v32 = vpop.eup %1777  ;;  %v589_v36 = vadd.f32 %v587_v29, %v449_v22  ;;  %v591_v22 = vsub.f32 1.0, %v578_v14 }
 0x1a2   : > { %551 = vrot.lane.b32.xlu2 %v1778_v32, %s1874_s24 }
 0x1a3   : > { %1779 = vtanh.f32 %v589_v36 }
 0x1a9   : > { %v1780_v34 = vpop.eup %1779 }
 0x1aa   : > { %555 = vrot.lane.b32.xlu2 %v2106_v28, %s1875_s26  ;;  %593 = vrot.lane.b32.xlu0 %v1780_v34, %s1874_s24 }
 0x1fc   : > { %v552_v37 = vpop.permute.xlu2 %551 }
 0x1fd   : > { %v554_v44 = vmul.f32 %v552_v37, %v549_v40 }
 0x204   : > { %v556_v42 = vpop.permute.xlu2 %555 }
 0x205   : > { %v558_v12 = vmul.f32 %v556_v42, %v536_v56 }
 0x207   : > { %v559_v30 = vadd.f32 %v558_v12, %v554_v44 }
 0x209   : > { %600 = vrot.lane.b32.xlu1 %v559_v30, %s1874_s24 }
 0x21c   : > { %v594_v31 = vpop.permute.xlu0 %593 }
 0x21d   : > { %v596_v48 = vmul.f32 %v594_v31, %v591_v22 }
 0x21f   : > { %v598_v49 = vadd.f32 %v597_v46, %v596_v48 }
 0x221   : > { %606 = vst.msk [vmem:[#allocation2 + $0x38] sm:$0xff] %vm605_vm10, %v598_v49 }
 0x27b   : > { %v601_v51 = vpop.permute.xlu1 %600 }
 0x27c   : > { %604 = vst.msk [vmem:[#allocation2] sm:$0xff] %vm603_vm11, %v601_v51  ;;  %v2228_v52 = vsel %vm603_vm11, %v601_v51, %v598_v49 }
 0x27d   : > { %1715 = vmatmul.msk.f32.vlgmr.msra.gmra.mxu2 %vm474_vm1, %v2228_v52  ;;  %1716 = vmatmul.msk.f32.vlgmr.msra.gmra.mxu3 %vm474_vm1, %v2228_v52 }
 0x27e   : > { %881 = vmatpush.msra.mxu2 %v1941_v2  ;;  %901 = vmatpush.msra.mxu3 %v1946_v3 }
 0x280   : > { %882 = vmatpush.msra.mxu2 %v1954_v4  ;;  %902 = vmatpush.msra.mxu3 %v1959_v5 }
 0x282   : > { %883 = vmatpush.msra.mxu2 %v1981_v7  ;;  %903 = vmatpush.msra.mxu3 %v1967_v6 }
 0x284   : > { %884 = vmatpush.msra.mxu2 %v1993_v10  ;;  %904 = vmatpush.msra.mxu3 %v1998_v11 }
 0x286   : > { %885 = vmatpush.msra.mxu2 %v2024_v16  ;;  %905 = vmatpush.msra.mxu3 %v2019_v15 }
 0x288   : > { %886 = vmatpush.msra.mxu2 %v2039_v18  ;;  %906 = vmatpush.msra.mxu3 %v2034_v17 }
 0x28a   : > { %887 = vmatpush.msra.mxu2 %v2056_v21  ;;  %907 = vmatpush.msra.mxu3 %v2050_v20 }
 0x28c   : > { %888 = vmatpush.msra.mxu2 %v2079_v25  ;;  %908 = vmatpush.msra.mxu3 %v2070_v23 }
 0x300   : > { %v628_v28 = vpop.f32.mrf.mxu2  ;;  %v648_v54 = vpop.f32.mrf.mxu3 }
 0x301   : > { %v629_v55 = vadd.f32 %v628_v28, %v2195_v47  ;;  %v649_v56 = vadd.f32 %v648_v54, %v2201_v53 }
 0x303   : > { %714 = vrot.lane.b32.xlu0 %v649_v56, %s1873_s23  ;;  %672 = vrot.lane.b32.xlu2 %v629_v55, %s1873_s23  ;;  %v651_v58 = vadd.f32 %v629_v55, %v2182_v38  ;;  %v693_v8 = vadd.f32 %v649_v56, %v2215_v9 }
 0x305   : > { %v1717_v60 = vmul.f32 -1.442695, %v651_v58  ;;  %v1718_v14 = vmul.f32 -1.442695, %v693_v8 }
 0x307   : > { %1781 = vpow2.f32 %v1717_v60 }
 0x30d   : > { %v1782_v62 = vpop.eup %1781 }
 0x30e   : > { %v655_v0 = vadd.f32 1.0, %v1782_v62 }
 0x310   : > { %1783 = vrcp.f32 %v655_v0  ;;  %v667_v36 = vand.u32 2147483648, %v655_v0  ;;  %vm661_vm13 = vweird.f32 %v655_v0  ;;  %v665_v34 = vand.u32 2147483647, %v655_v0 }
 0x311   : > { %1785 = vpow2.f32 %v1718_v14 }
 0x312   : > { %v668_v40 = vor.u32 1.1754944e-38, %v667_v36  ;;  %vm666_vm15 = vcmp.eq.f32.partialorder %v665_v34, 8.507059e+37 }
 0x316   : > { %v1784_v13 = vpop.eup %1783 }
 0x317   : > { %v657_v19 = vmul.f32 %v1784_v13, %v655_v0  ;;  %v1786_v26 = vpop.eup %1785  ;;  %vm662_vm12 = vweird.f32 %v1784_v13 }
 0x318   : > { %v697_v29 = vadd.f32 1.0, %v1786_v26  ;;  %vm663_vm14 = vmor %vm661_vm13, %vm662_vm12 }
 0x319   : > { %v658_v24 = vsub.f32 1.0, %v657_v19 }
 0x31a   : > { %1787 = vrcp.f32 %v697_v29  ;;  %v709_v49 = vand.u32 2147483648, %v697_v29  ;;  %vm703_vm2 = vweird.f32 %v697_v29  ;;  %v707_v51 = vand.u32 2147483647, %v697_v29 }
 0x31b   : > { %v659_v27 = vmul.f32 %v1784_v13, %v658_v24 }
 0x31c   : > { %v710_v54 = vor.u32 1.1754944e-38, %v709_v49  ;;  %vm708_vm4 = vcmp.eq.f32.partialorder %v707_v51, 8.507059e+37 }
 0x31d   : > { %v660_v32 = vadd.f32 %v1784_v13, %v659_v27 }
 0x31f   : > { %v664_v37 = vsel %vm663_vm14, %v1784_v13, %v660_v32 }
 0x320   : > { %v669_v44 = vsel %vm666_vm15, %v668_v40, %v664_v37  ;;  %v1788_v30 = vpop.eup %1787 }
 0x321   : > { %v699_v22 = vmul.f32 %v1788_v30, %v697_v29  ;;  %vm704_vm0 = vweird.f32 %v1788_v30 }
 0x322   : > { %vm705_vm3 = vmor %vm703_vm2, %vm704_vm0 }
 0x323   : > { %v700_v31 = vsub.f32 1.0, %v699_v22 }
 0x325   : > { %v701_v46 = vmul.f32 %v1788_v30, %v700_v31 }
 0x327   : > { %v702_v48 = vadd.f32 %v1788_v30, %v701_v46 }
 0x329   : > { %v706_v28 = vsel %vm705_vm3, %v1788_v30, %v702_v48 }
 0x32a   : > { %v711_v56 = vsel %vm708_vm4, %v710_v54, %v706_v28 }
 0x32b   : > { %v724_v19 = vsub.f32 1.0, %v711_v56  ;;  %v730_v26 = vmul.f32 %v711_v56, %v2228_v52 }
 0x35d   : > { %v673_v42 = vpop.permute.xlu2 %672 }
 0x35e   : > { %v675_v12 = vmul.f32 %v673_v42, %v669_v44 }
 0x360   : > { %677 = vrot.lane.b32.xlu1 %v675_v12, %s1873_s23 }
 0x368   : > { %688 = vrot.lane.b32.xlu1 %v2228_v52, %s1875_s26 }
 0x375   : > { %v715_v55 = vpop.permute.xlu0 %714 }
 0x376   : > { %v717_v58 = vmul.f32 %v715_v55, %v711_v56 }
 0x378   : > { %719 = vrot.lane.b32.xlu2 %v717_v58, %s1873_s23 }
 0x3d2   : > { %v720_v60 = vpop.permute.xlu2 %719  ;;  %v678_v62 = vpop.permute.xlu1 %677 }
 0x3d3   : > { %v722_v0 = vadd.f32 %v720_v60, %v2215_v9  ;;  %v680_v8 = vadd.f32 %v678_v62, %v2182_v38  ;;  %v682_v9 = vsub.f32 1.0, %v669_v44 }
 0x3d5   : > { %1789 = vtanh.f32 %v722_v0 }
 0x3d6   : > { %1791 = vtanh.f32 %v680_v8 }
 0x3da   : > { %v689_v32 = vpop.permute.xlu1 %688 }
 0x3db   : > { %v1790_v13 = vpop.eup %1789  ;;  %v691_v38 = vmul.f32 %v689_v32, %v669_v44 }
 0x3dc   : > { %v1792_v14 = vpop.eup %1791  ;;  %726 = vrot.lane.b32.xlu2 %v1790_v13, %s1874_s24 }
 0x3dd   : > { %684 = vrot.lane.b32.xlu0 %v1792_v14, %s1874_s24 }
 0x436   : > { %v727_v24 = vpop.permute.xlu2 %726 }
 0x437   : > { %v729_v27 = vmul.f32 %v727_v24, %v724_v19 }
 0x439   : > { %v731_v29 = vadd.f32 %v730_v26, %v729_v27 }
 0x43b   : > { %737 = vst.msk [vmem:[#allocation2 + $0x30] sm:$0xff] %vm605_vm10, %v731_v29 }
 0x44f   : > { %v685_v36 = vpop.permute.xlu0 %684 }
 0x450   : > { %v687_v34 = vmul.f32 %v685_v36, %v682_v9 }
 0x452   : > { %v692_v37 = vadd.f32 %v691_v38, %v687_v34 }
 0x454   : > { %733 = vrot.lane.b32.xlu0 %v692_v37, %s1874_s24 }
 0x4c6   : > { %v734_v40 = vpop.permute.xlu0 %733 }
 0x4c7   : > { %736 = vst.msk [vmem:[#allocation2 + $0x8] sm:$0xff] %vm603_vm11, %v734_v40  ;;  %v2269_v42 = vsel %vm603_vm11, %v734_v40, %v731_v29 }
 0x4c8   : > { %1719 = vmatmul.msk.f32.vlgmr.msrb.gmra.mxu2 %vm474_vm1, %v2269_v42  ;;  %1720 = vmatmul.msk.f32.vlgmr.msrb.gmra.mxu3 %vm474_vm1, %v2269_v42 }
 0x4c9   : > { %1143 = vmatpush.msrb.mxu2 %v1941_v2  ;;  %1163 = vmatpush.msrb.mxu3 %v1946_v3 }
 0x4cb   : > { %1144 = vmatpush.msrb.mxu2 %v1954_v4  ;;  %1164 = vmatpush.msrb.mxu3 %v1959_v5 }
 0x4cd   : > { %1145 = vmatpush.msrb.mxu2 %v1981_v7  ;;  %1165 = vmatpush.msrb.mxu3 %v1967_v6 }
 0x4cf   : > { %1146 = vmatpush.msrb.mxu2 %v1993_v10  ;;  %1166 = vmatpush.msrb.mxu3 %v1998_v11 }
 0x4d1   : > { %1147 = vmatpush.msrb.mxu2 %v2024_v16  ;;  %1167 = vmatpush.msrb.mxu3 %v2019_v15 }
 0x4d3   : > { %1148 = vmatpush.msrb.mxu2 %v2039_v18  ;;  %1168 = vmatpush.msrb.mxu3 %v2034_v17 }
 0x4d5   : > { %1149 = vmatpush.msrb.mxu2 %v2056_v21  ;;  %1169 = vmatpush.msrb.mxu3 %v2050_v20 }
 0x4d7   : > { %1150 = vmatpush.msrb.mxu2 %v2079_v25  ;;  %1170 = vmatpush.msrb.mxu3 %v2070_v23 }
 0x54b   : > { %v759_v52 = vpop.f32.mrf.mxu2  ;;  %v779_v44 = vpop.f32.mrf.mxu3 }
 0x54c   : > { %v760_v12 = vadd.f32 %v759_v52, %v2195_v47  ;;  %v780_v30 = vadd.f32 %v779_v44, %v2201_v53 }
 0x54e   : > { %845 = vrot.lane.b32.xlu2 %v780_v30, %s1873_s23  ;;  %803 = vrot.lane.b32.xlu1 %v760_v12, %s1873_s23  ;;  %v824_v22 = vadd.f32 %v780_v30, %v2213_v1  ;;  %v782_v49 = vadd.f32 %v760_v12, %v2188_v43 }
 0x550   : > { %v1722_v31 = vmul.f32 -1.442695, %v824_v22  ;;  %v1721_v28 = vmul.f32 -1.442695, %v782_v49 }
 0x552   : > { %1793 = vpow2.f32 %v1722_v31 }
 0x558   : > { %v1794_v46 = vpop.eup %1793 }
 0x559   : > { %v828_v48 = vadd.f32 1.0, %v1794_v46 }
 0x55b   : > { %1795 = vrcp.f32 %v828_v48  ;;  %v840_v0 = vand.u32 2147483648, %v828_v48  ;;  %vm834_vm6 = vweird.f32 %v828_v48  ;;  %v838_v8 = vand.u32 2147483647, %v828_v48 }
 0x55c   : > { %1797 = vpow2.f32 %v1721_v28 }
 0x55d   : > { %v841_v14 = vor.u32 1.1754944e-38, %v840_v0  ;;  %vm839_vm8 = vcmp.eq.f32.partialorder %v838_v8, 8.507059e+37 }
 0x561   : > { %v1796_v51 = vpop.eup %1795 }
 0x562   : > { %v830_v54 = vmul.f32 %v1796_v51, %v828_v48  ;;  %v1798_v56 = vpop.eup %1797  ;;  %vm835_vm5 = vweird.f32 %v1796_v51 }
 0x563   : > { %v786_v60 = vadd.f32 1.0, %v1798_v56  ;;  %vm836_vm7 = vmor %vm834_vm6, %vm835_vm5 }
 0x564   : > { %v831_v55 = vsub.f32 1.0, %v830_v54 }
 0x565   : > { %1799 = vrcp.f32 %v786_v60  ;;  %v798_v38 = vand.u32 2147483648, %v786_v60  ;;  %vm792_vm12 = vweird.f32 %v786_v60  ;;  %v796_v34 = vand.u32 2147483647, %v786_v60 }
 0x566   : > { %v832_v58 = vmul.f32 %v1796_v51, %v831_v55 }
 0x567   : > { %v799_v40 = vor.u32 1.1754944e-38, %v798_v38  ;;  %vm797_vm14 = vcmp.eq.f32.partialorder %v796_v34, 8.507059e+37 }
 0x568   : > { %v833_v62 = vadd.f32 %v1796_v51, %v832_v58 }
 0x56a   : > { %v837_v13 = vsel %vm836_vm7, %v1796_v51, %v833_v62 }
 0x56b   : > { %v842_v24 = vsel %vm839_vm8, %v841_v14, %v837_v13  ;;  %v1800_v27 = vpop.eup %1799 }
 0x56c   : > { %v788_v29 = vmul.f32 %v1800_v27, %v786_v60  ;;  %vm793_vm9 = vweird.f32 %v1800_v27  ;;  %v855_v28 = vsub.f32 1.0, %v842_v24  ;;  %v861_v60 = vmul.f32 %v842_v24, %v2269_v42 }
 0x56d   : > { %vm794_vm13 = vmor %vm792_vm12, %vm793_vm9 }
 0x56e   : > { %v789_v32 = vsub.f32 1.0, %v788_v29 }
 0x570   : > { %v790_v9 = vmul.f32 %v1800_v27, %v789_v32 }
 0x572   : > { %v791_v36 = vadd.f32 %v1800_v27, %v790_v9 }
 0x574   : > { %v795_v37 = vsel %vm794_vm13, %v1800_v27, %v791_v36 }
 0x575   : > { %v800_v44 = vsel %vm797_vm14, %v799_v40, %v795_v37 }
 0x576   : > { %v813_v54 = vsub.f32 1.0, %v800_v44 }
 0x5a8   : > { %v846_v19 = vpop.permute.xlu2 %845 }
 0x5a9   : > { %v848_v26 = vmul.f32 %v846_v19, %v842_v24 }
 0x5ab   : > { %850 = vrot.lane.b32.xlu1 %v848_v26, %s1873_s23 }
 0x5c0   : > { %v804_v52 = vpop.permute.xlu1 %803 }
 0x5c1   : > { %v806_v12 = vmul.f32 %v804_v52, %v800_v44 }
 0x5c3   : > { %808 = vrot.lane.b32.xlu0 %v806_v12, %s1873_s23 }
 0x5cb   : > { %819 = vrot.lane.b32.xlu0 %v2269_v42, %s1875_s26 }
 0x61d   : > { %v851_v30 = vpop.permute.xlu1 %850 }
 0x61e   : > { %v853_v22 = vadd.f32 %v851_v30, %v2213_v1 }
 0x620   : > { %1801 = vtanh.f32 %v853_v22 }
 0x626   : > { %v1802_v31 = vpop.eup %1801 }
 0x627   : > { %857 = vrot.lane.b32.xlu1 %v1802_v31, %s1874_s24 }
 0x635   : > { %v809_v46 = vpop.permute.xlu0 %808 }
 0x636   : > { %v811_v48 = vadd.f32 %v809_v46, %v2188_v43 }
 0x638   : > { %1803 = vtanh.f32 %v811_v48 }
 0x63d   : > { %v820_v51 = vpop.permute.xlu0 %819 }
 0x63e   : > { %v1804_v49 = vpop.eup %1803  ;;  %v822_v58 = vmul.f32 %v820_v51, %v800_v44 }
 0x63f   : > { %815 = vrot.lane.b32.xlu2 %v1804_v49, %s1874_s24 }
 0x699   : > { %v858_v55 = vpop.permute.xlu1 %857  ;;  %v816_v56 = vpop.permute.xlu2 %815 }
 0x69a   : > { %v860_v1 = vmul.f32 %v858_v55, %v855_v28  ;;  %v818_v62 = vmul.f32 %v816_v56, %v813_v54 }
 0x69c   : > { %v862_v0 = vadd.f32 %v861_v60, %v860_v1  ;;  %v823_v8 = vadd.f32 %v822_v58, %v818_v62 }
 0x69e   : > { %864 = vrot.lane.b32.xlu2 %v823_v8, %s1874_s24  ;;  %868 = vst.msk [vmem:[#allocation2 + $0x28] sm:$0xff] %vm605_vm10, %v862_v0 }
 0x6f8   : > { %v865_v43 = vpop.permute.xlu2 %864 }
 0x6f9   : > { %867 = vst.msk [vmem:[#allocation2 + $0x10] sm:$0xff] %vm603_vm11, %v865_v43  ;;  %v2310_v13 = vsel %vm603_vm11, %v865_v43, %v862_v0 }
 0x6fa   : > { %1723 = vmatmul.msk.f32.vlgmr.msra.gmra.mxu2 %vm474_vm1, %v2310_v13  ;;  %1724 = vmatmul.msk.f32.vlgmr.msra.gmra.mxu3 %vm474_vm1, %v2310_v13 }
 0x6fb   : > { %1405 = vmatpush.msra.mxu2 %v1941_v2  ;;  %1425 = vmatpush.msra.mxu3 %v1946_v3 }
 0x6fd   : > { %1406 = vmatpush.msra.mxu2 %v1954_v4  ;;  %1426 = vmatpush.msra.mxu3 %v1959_v5 }
 0x6ff   : > { %1407 = vmatpush.msra.mxu2 %v1981_v7  ;;  %1427 = vmatpush.msra.mxu3 %v1967_v6 }
 0x701   : > { %1408 = vmatpush.msra.mxu2 %v1993_v10  ;;  %1428 = vmatpush.msra.mxu3 %v1998_v11 }
 0x703   : > { %1409 = vmatpush.msra.mxu2 %v2024_v16  ;;  %1429 = vmatpush.msra.mxu3 %v2019_v15 }
 0x705   : > { %1410 = vmatpush.msra.mxu2 %v2039_v18  ;;  %1430 = vmatpush.msra.mxu3 %v2034_v17 }
 0x707   : > { %1411 = vmatpush.msra.mxu2 %v2056_v21  ;;  %1431 = vmatpush.msra.mxu3 %v2050_v20 }
 0x709   : > { %1412 = vmatpush.msra.mxu2 %v2079_v25  ;;  %1432 = vmatpush.msra.mxu3 %v2070_v23 }
 0x77d   : > { %v890_v2 = vpop.f32.mrf.mxu2  ;;  %v910_v3 = vpop.f32.mrf.mxu3 }
 0x77e   : > { %v891_v4 = vadd.f32 %v890_v2, %v2195_v47  ;;  %v911_v5 = vadd.f32 %v910_v3, %v2201_v53 }
 0x780   : > { %976 = vrot.lane.b32.xlu1 %v911_v5, %s1873_s23  ;;  %934 = vrot.lane.b32.xlu0 %v891_v4, %s1873_s23  ;;  %v913_v6 = vadd.f32 %v891_v4, %v2178_v33  ;;  %v955_v7 = vadd.f32 %v911_v5, %v2211_v63 }
 0x782   : > { %v1725_v10 = vmul.f32 -1.442695, %v913_v6  ;;  %v1726_v11 = vmul.f32 -1.442695, %v955_v7 }
 0x784   : > { %1805 = vpow2.f32 %v1725_v10 }
 0x785   : > { %1807 = vpow2.f32 %v1726_v11 }
 0x78a   : > { %v1806_v15 = vpop.eup %1805 }
 0x78b   : > { %v1808_v16 = vpop.eup %1807  ;;  %v917_v17 = vadd.f32 1.0, %v1806_v15 }
 0x78c   : > { %v959_v18 = vadd.f32 1.0, %v1808_v16 }
 0x78d   : > { %1809 = vrcp.f32 %v917_v17  ;;  %vm923_vm2 = vweird.f32 %v917_v17  ;;  %v929_v32 = vand.u32 2147483648, %v917_v17  ;;  %v927_v36 = vand.u32 2147483647, %v917_v17 }
 0x78e   : > { %1811 = vrcp.f32 %v959_v18  ;;  %v971_v29 = vand.u32 2147483648, %v959_v18  ;;  %vm965_vm3 = vweird.f32 %v959_v18  ;;  %v969_v9 = vand.u32 2147483647, %v959_v18 }
 0x78f   : > { %v930_v40 = vor.u32 1.1754944e-38, %v929_v32  ;;  %vm928_vm7 = vcmp.eq.f32.partialorder %v927_v36, 8.507059e+37 }
 0x790   : > { %v972_v37 = vor.u32 1.1754944e-38, %v971_v29  ;;  %vm970_vm6 = vcmp.eq.f32.partialorder %v969_v9, 8.507059e+37 }
 0x793   : > { %v1810_v20 = vpop.eup %1809 }
 0x794   : > { %v1812_v21 = vpop.eup %1811  ;;  %v919_v25 = vmul.f32 %v1810_v20, %v917_v17  ;;  %vm924_vm15 = vweird.f32 %v1810_v20 }
 0x795   : > { %v961_v23 = vmul.f32 %v1812_v21, %v959_v18  ;;  %vm966_vm0 = vweird.f32 %v1812_v21  ;;  %vm925_vm4 = vmor %vm923_vm2, %vm924_vm15 }
 0x796   : > { %v920_v14 = vsub.f32 1.0, %v919_v25  ;;  %vm967_vm5 = vmor %vm965_vm3, %vm966_vm0 }
 0x797   : > { %v962_v42 = vsub.f32 1.0, %v961_v23 }
 0x798   : > { %v921_v24 = vmul.f32 %v1810_v20, %v920_v14 }
 0x799   : > { %v963_v19 = vmul.f32 %v1812_v21, %v962_v42 }
 0x79a   : > { %v922_v27 = vadd.f32 %v1810_v20, %v921_v24 }
 0x79b   : > { %v964_v26 = vadd.f32 %v1812_v21, %v963_v19 }
 0x79c   : > { %v926_v34 = vsel %vm925_vm4, %v1810_v20, %v922_v27 }
 0x79d   : > { %v968_v38 = vsel %vm967_vm5, %v1812_v21, %v964_v26  ;;  %v931_v30 = vsel %vm928_vm7, %v930_v40, %v926_v34 }
 0x79e   : > { %v973_v44 = vsel %vm970_vm6, %v972_v37, %v968_v38  ;;  %v944_v56 = vsub.f32 1.0, %v931_v30 }
 0x79f   : > { %v992_v8 = vmul.f32 %v973_v44, %v2310_v13 }
 0x7f2   : > { %v977_v52 = vpop.permute.xlu1 %976  ;;  %v935_v12 = vpop.permute.xlu0 %934 }
 0x7f3   : > { %v979_v22 = vmul.f32 %v977_v52, %v973_v44  ;;  %v937_v31 = vmul.f32 %v935_v12, %v931_v30 }
 0x7f5   : > { %981 = vrot.lane.b32.xlu0 %v979_v22, %s1873_s23  ;;  %939 = vrot.lane.b32.xlu2 %v937_v31, %s1873_s23 }
 0x7fd   : > { %950 = vrot.lane.b32.xlu2 %v2310_v13, %s1875_s26 }
 0x84f   : > { %v940_v46 = vpop.permute.xlu2 %939 }
 0x850   : > { %v942_v48 = vadd.f32 %v940_v46, %v2178_v33  ;;  %v986_v33 = vsub.f32 1.0, %v973_v44 }
 0x852   : > { %1813 = vtanh.f32 %v942_v48 }
 0x857   : > { %v951_v55 = vpop.permute.xlu2 %950 }
 0x858   : > { %v1814_v49 = vpop.eup %1813  ;;  %v953_v60 = vmul.f32 %v951_v55, %v931_v30 }
 0x859   : > { %946 = vrot.lane.b32.xlu1 %v1814_v49, %s1874_s24 }
 0x867   : > { %v982_v51 = vpop.permute.xlu0 %981 }
 0x868   : > { %v984_v28 = vadd.f32 %v982_v51, %v2211_v63 }
 0x86a   : > { %1815 = vtanh.f32 %v984_v28 }
 0x870   : > { %v1816_v54 = vpop.eup %1815 }
 0x871   : > { %988 = vrot.lane.b32.xlu0 %v1816_v54, %s1874_s24 }
 0x8cb   : > { %v947_v58 = vpop.permute.xlu1 %946 }
 0x8cc   : > { %v949_v1 = vmul.f32 %v947_v58, %v944_v56 }
 0x8ce   : > { %v954_v62 = vadd.f32 %v953_v60, %v949_v1 }
 0x8d0   : > { %995 = vrot.lane.b32.xlu1 %v954_v62, %s1874_s24 }
 0x8e3   : > { %v989_v0 = vpop.permute.xlu0 %988 }
 0x8e4   : > { %v991_v43 = vmul.f32 %v989_v0, %v986_v33 }
 0x8e6   : > { %v993_v2 = vadd.f32 %v992_v8, %v991_v43 }
 0x8e8   : > { %999 = vst.msk [vmem:[#allocation2 + $0x20] sm:$0xff] %vm605_vm10, %v993_v2 }
 0x942   : > { %v996_v63 = vpop.permute.xlu1 %995 }
 0x943   : > { %998 = vst.msk [vmem:[#allocation2 + $0x18] sm:$0xff] %vm603_vm11, %v996_v63  ;;  %v2351_v3 = vsel %vm603_vm11, %v996_v63, %v993_v2 }
 0x944   : > { %1727 = vmatmul.msk.f32.vlgmr.msra.gmra.mxu0 %vm474_vm1, %v2351_v3  ;;  %1728 = vmatmul.msk.f32.vlgmr.msra.gmra.mxu1 %vm474_vm1, %v2351_v3 }
 0x9c1   : > { %v1021_v4 = vpop.f32.mrf.mxu0  ;;  %v1041_v5 = vpop.f32.mrf.mxu1 }
 0x9c2   : > { %v1022_v13 = vadd.f32 %v1021_v4, %v2195_v47  ;;  %v1042_v6 = vadd.f32 %v1041_v5, %v2201_v53 }
 0x9c4   : > { %1107 = vrot.lane.b32.xlu0 %v1042_v6, %s1873_s23  ;;  %1065 = vrot.lane.b32.xlu2 %v1022_v13, %s1873_s23  ;;  %v1044_v7 = vadd.f32 %v1022_v13, %v2184_v39  ;;  %v1086_v16 = vadd.f32 %v1042_v6, %v2209_v61 }
 0x9c6   : > { %v1729_v10 = vmul.f32 -1.442695, %v1044_v7  ;;  %v1730_v18 = vmul.f32 -1.442695, %v1086_v16 }
 0x9c8   : > { %1817 = vpow2.f32 %v1729_v10 }
 0x9ce   : > { %v1818_v11 = vpop.eup %1817 }
 0x9cf   : > { %v1048_v15 = vadd.f32 1.0, %v1818_v11 }
 0x9d1   : > { %1819 = vrcp.f32 %v1048_v15  ;;  %v1060_v19 = vand.u32 2147483648, %v1048_v15  ;;  %vm1054_vm9 = vweird.f32 %v1048_v15  ;;  %v1058_v24 = vand.u32 2147483647, %v1048_v15 }
 0x9d2   : > { %1821 = vpow2.f32 %v1730_v18 }
 0x9d3   : > { %v1061_v27 = vor.u32 1.1754944e-38, %v1060_v19  ;;  %vm1059_vm13 = vcmp.eq.f32.partialorder %v1058_v24, 8.507059e+37 }
 0x9d7   : > { %v1820_v17 = vpop.eup %1819 }
 0x9d8   : > { %v1050_v20 = vmul.f32 %v1820_v17, %v1048_v15  ;;  %v1822_v23 = vpop.eup %1821  ;;  %vm1055_vm8 = vweird.f32 %v1820_v17 }
 0x9d9   : > { %v1090_v42 = vadd.f32 1.0, %v1822_v23  ;;  %vm1056_vm12 = vmor %vm1054_vm9, %vm1055_vm8 }
 0x9da   : > { %v1051_v21 = vsub.f32 1.0, %v1050_v20 }
 0x9db   : > { %1823 = vrcp.f32 %v1090_v42  ;;  %v1102_v52 = vand.u32 2147483648, %v1090_v42  ;;  %vm1096_vm15 = vweird.f32 %v1090_v42  ;;  %v1100_v44 = vand.u32 2147483647, %v1090_v42 }
 0x9dc   : > { %v1052_v25 = vmul.f32 %v1820_v17, %v1051_v21 }
 0x9dd   : > { %v1103_v30 = vor.u32 1.1754944e-38, %v1102_v52  ;;  %vm1101_vm2 = vcmp.eq.f32.partialorder %v1100_v44, 8.507059e+37 }
 0x9de   : > { %v1053_v14 = vadd.f32 %v1820_v17, %v1052_v25 }
 0x9e0   : > { %v1057_v26 = vsel %vm1056_vm12, %v1820_v17, %v1053_v14 }
 0x9e1   : > { %v1062_v32 = vsel %vm1059_vm13, %v1061_v27, %v1057_v26  ;;  %v1824_v36 = vpop.eup %1823 }
 0x9e2   : > { %v1092_v38 = vmul.f32 %v1824_v36, %v1090_v42  ;;  %vm1097_vm14 = vweird.f32 %v1824_v36 }
 0x9e3   : > { %vm1098_vm0 = vmor %vm1096_vm15, %vm1097_vm14 }
 0x9e4   : > { %v1093_v34 = vsub.f32 1.0, %v1092_v38 }
 0x9e6   : > { %v1094_v37 = vmul.f32 %v1824_v36, %v1093_v34 }
 0x9e8   : > { %v1095_v40 = vadd.f32 %v1824_v36, %v1094_v37 }
 0x9ea   : > { %v1099_v12 = vsel %vm1098_vm0, %v1824_v36, %v1095_v40 }
 0x9eb   : > { %v1104_v31 = vsel %vm1101_vm2, %v1103_v30, %v1099_v12 }
 0x9ec   : > { %v1117_v56 = vsub.f32 1.0, %v1104_v31  ;;  %v1123_v60 = vmul.f32 %v1104_v31, %v2351_v3 }
 0xa1e   : > { %v1066_v29 = vpop.permute.xlu2 %1065 }
 0xa1f   : > { %v1068_v9 = vmul.f32 %v1066_v29, %v1062_v32 }
 0xa21   : > { %1070 = vrot.lane.b32.xlu1 %v1068_v9, %s1873_s23 }
 0xa29   : > { %1081 = vrot.lane.b32.xlu1 %v2351_v3, %s1875_s26 }
 0xa36   : > { %v1108_v22 = vpop.permute.xlu0 %1107 }
 0xa37   : > { %v1110_v46 = vmul.f32 %v1108_v22, %v1104_v31 }
 0xa39   : > { %1112 = vrot.lane.b32.xlu2 %v1110_v46, %s1873_s23 }
 0xa93   : > { %v1113_v48 = vpop.permute.xlu2 %1112  ;;  %v1071_v49 = vpop.permute.xlu1 %1070 }
 0xa94   : > { %v1115_v51 = vadd.f32 %v1113_v48, %v2209_v61  ;;  %v1073_v28 = vadd.f32 %v1071_v49, %v2184_v39  ;;  %v1075_v61 = vsub.f32 1.0, %v1062_v32 }
 0xa96   : > { %1825 = vtanh.f32 %v1115_v51 }
 0xa97   : > { %1827 = vtanh.f32 %v1073_v28 }
 0xa9b   : > { %v1082_v33 = vpop.permute.xlu1 %1081 }
 0xa9c   : > { %v1826_v54 = vpop.eup %1825  ;;  %v1084_v39 = vmul.f32 %v1082_v33, %v1062_v32 }
 0xa9d   : > { %v1828_v55 = vpop.eup %1827  ;;  %1119 = vrot.lane.b32.xlu2 %v1826_v54, %s1874_s24 }
 0xa9e   : > { %1077 = vrot.lane.b32.xlu0 %v1828_v55, %s1874_s24 }
 0xaf7   : > { %v1120_v58 = vpop.permute.xlu2 %1119 }
 0xaf8   : > { %v1122_v1 = vmul.f32 %v1120_v58, %v1117_v56 }
 0xafa   : > { %v1124_v62 = vadd.f32 %v1123_v60, %v1122_v1 }
 0xafc   : > { %1130 = vst.msk [vmem:[#allocation2 + $0x18] sm:$0xff] %vm605_vm10, %v1124_v62 }
 0xb10   : > { %v1078_v0 = vpop.permute.xlu0 %1077 }
 0xb11   : > { %v1080_v8 = vmul.f32 %v1078_v0, %v1075_v61 }
 0xb13   : > { %v1085_v43 = vadd.f32 %v1084_v39, %v1080_v8 }
 0xb15   : > { %1126 = vrot.lane.b32.xlu0 %v1085_v43, %s1874_s24 }
 0xb87   : > { %v1127_v2 = vpop.permute.xlu0 %1126 }
 0xb88   : > { %1129 = vst.msk [vmem:[#allocation2 + $0x20] sm:$0xff] %vm603_vm11, %v1127_v2  ;;  %v2376_v63 = vsel %vm603_vm11, %v1127_v2, %v1124_v62 }
 0xb89   : > { %1731 = vmatmul.msk.f32.vlgmr.msrb.gmra.mxu2 %vm474_vm1, %v2376_v63  ;;  %1732 = vmatmul.msk.f32.vlgmr.msrb.gmra.mxu3 %vm474_vm1, %v2376_v63 }
 0xc0c   : > { %v1152_v3 = vpop.f32.mrf.mxu2  ;;  %v1172_v4 = vpop.f32.mrf.mxu3 }
 0xc0d   : > { %v1153_v5 = vadd.f32 %v1152_v3, %v2195_v47  ;;  %v1173_v13 = vadd.f32 %v1172_v4, %v2201_v53 }
 0xc0f   : > { %1238 = vrot.lane.b32.xlu2 %v1173_v13, %s1873_s23  ;;  %1196 = vrot.lane.b32.xlu1 %v1153_v5, %s1873_s23  ;;  %v1217_v6 = vadd.f32 %v1173_v13, %v2207_v59  ;;  %v1175_v15 = vadd.f32 %v1153_v5, %v2190_v45 }
 0xc11   : > { %v1734_v7 = vmul.f32 -1.442695, %v1217_v6  ;;  %v1733_v17 = vmul.f32 -1.442695, %v1175_v15 }
 0xc13   : > { %1829 = vpow2.f32 %v1734_v7 }
 0xc19   : > { %v1830_v10 = vpop.eup %1829 }
 0xc1a   : > { %v1221_v11 = vadd.f32 1.0, %v1830_v10 }
 0xc1c   : > { %1831 = vrcp.f32 %v1221_v11  ;;  %v1233_v14 = vand.u32 2147483648, %v1221_v11  ;;  %vm1227_vm4 = vweird.f32 %v1221_v11  ;;  %v1231_v19 = vand.u32 2147483647, %v1221_v11 }
 0xc1d   : > { %1833 = vpow2.f32 %v1733_v17 }
 0xc1e   : > { %v1234_v26 = vor.u32 1.1754944e-38, %v1233_v14  ;;  %vm1232_vm6 = vcmp.eq.f32.partialorder %v1231_v19, 8.507059e+37 }
 0xc22   : > { %v1832_v16 = vpop.eup %1831 }
 0xc23   : > { %v1223_v18 = vmul.f32 %v1832_v16, %v1221_v11  ;;  %v1834_v21 = vpop.eup %1833  ;;  %vm1228_vm3 = vweird.f32 %v1832_v16 }
 0xc24   : > { %v1179_v25 = vadd.f32 1.0, %v1834_v21  ;;  %vm1229_vm5 = vmor %vm1227_vm4, %vm1228_vm3 }
 0xc25   : > { %v1224_v20 = vsub.f32 1.0, %v1223_v18 }
 0xc26   : > { %1835 = vrcp.f32 %v1179_v25  ;;  %v1191_v40 = vand.u32 2147483648, %v1179_v25  ;;  %vm1185_vm8 = vweird.f32 %v1179_v25  ;;  %v1189_v52 = vand.u32 2147483647, %v1179_v25 }
 0xc27   : > { %v1225_v23 = vmul.f32 %v1832_v16, %v1224_v20 }
 0xc28   : > { %v1192_v12 = vor.u32 1.1754944e-38, %v1191_v40  ;;  %vm1190_vm12 = vcmp.eq.f32.partialorder %v1189_v52, 8.507059e+37 }
 0xc29   : > { %v1226_v42 = vadd.f32 %v1832_v16, %v1225_v23 }
 0xc2b   : > { %v1230_v24 = vsel %vm1229_vm5, %v1832_v16, %v1226_v42 }
 0xc2c   : > { %v1235_v29 = vsel %vm1232_vm6, %v1234_v26, %v1230_v24  ;;  %v1836_v9 = vpop.eup %1835 }
 0xc2d   : > { %v1181_v36 = vmul.f32 %v1836_v9, %v1179_v25  ;;  %vm1186_vm7 = vweird.f32 %v1836_v9  ;;  %v1248_v56 = vsub.f32 1.0, %v1235_v29  ;;  %v1254_v33 = vmul.f32 %v1235_v29, %v2376_v63 }
 0xc2e   : > { %vm1187_vm9 = vmor %vm1185_vm8, %vm1186_vm7 }
 0xc2f   : > { %v1182_v38 = vsub.f32 1.0, %v1181_v36 }
 0xc31   : > { %v1183_v34 = vmul.f32 %v1836_v9, %v1182_v38 }
 0xc33   : > { %v1184_v37 = vadd.f32 %v1836_v9, %v1183_v34 }
 0xc35   : > { %v1188_v44 = vsel %vm1187_vm9, %v1836_v9, %v1184_v37 }
 0xc36   : > { %v1193_v22 = vsel %vm1190_vm12, %v1192_v12, %v1188_v44 }
 0xc37   : > { %v1206_v58 = vsub.f32 1.0, %v1193_v22 }
 0xc69   : > { %v1239_v27 = vpop.permute.xlu2 %1238 }
 0xc6a   : > { %v1241_v32 = vmul.f32 %v1239_v27, %v1235_v29 }
 0xc6c   : > { %1243 = vrot.lane.b32.xlu1 %v1241_v32, %s1873_s23 }
 0xc81   : > { %v1197_v30 = vpop.permute.xlu1 %1196 }
 0xc82   : > { %v1199_v31 = vmul.f32 %v1197_v30, %v1193_v22 }
 0xc84   : > { %1201 = vrot.lane.b32.xlu0 %v1199_v31, %s1873_s23 }
 0xc8c   : > { %1212 = vrot.lane.b32.xlu0 %v2376_v63, %s1875_s26 }
 0xcde   : > { %v1244_v46 = vpop.permute.xlu1 %1243 }
 0xcdf   : > { %v1246_v48 = vadd.f32 %v1244_v46, %v2207_v59 }
 0xce1   : > { %1837 = vtanh.f32 %v1246_v48 }
 0xce7   : > { %v1838_v49 = vpop.eup %1837 }
 0xce8   : > { %1250 = vrot.lane.b32.xlu1 %v1838_v49, %s1874_s24 }
 0xcf6   : > { %v1202_v51 = vpop.permute.xlu0 %1201 }
 0xcf7   : > { %v1204_v28 = vadd.f32 %v1202_v51, %v2190_v45 }
 0xcf9   : > { %1839 = vtanh.f32 %v1204_v28 }
 0xcfe   : > { %v1213_v55 = vpop.permute.xlu0 %1212 }
 0xcff   : > { %v1840_v54 = vpop.eup %1839  ;;  %v1215_v62 = vmul.f32 %v1213_v55, %v1193_v22 }
 0xd00   : > { %1208 = vrot.lane.b32.xlu2 %v1840_v54, %s1874_s24 }
 0xd5a   : > { %v1251_v60 = vpop.permute.xlu1 %1250  ;;  %v1209_v1 = vpop.permute.xlu2 %1208 }
 0xd5b   : > { %v1253_v59 = vmul.f32 %v1251_v60, %v1248_v56  ;;  %v1211_v61 = vmul.f32 %v1209_v1, %v1206_v58 }
 0xd5d   : > { %v1255_v0 = vadd.f32 %v1254_v33, %v1253_v59  ;;  %v1216_v39 = vadd.f32 %v1215_v62, %v1211_v61 }
 0xd5f   : > { %1261 = vst.msk [vmem:[#allocation2 + $0x10] sm:$0xff] %vm605_vm10, %v1255_v0  ;;  %1257 = vrot.lane.b32.xlu2 %v1216_v39, %s1874_s24 }
 0xdb9   : > { %v1258_v45 = vpop.permute.xlu2 %1257 }
 0xdba   : > { %1260 = vst.msk [vmem:[#allocation2 + $0x28] sm:$0xff] %vm603_vm11, %v1258_v45  ;;  %v2401_v8 = vsel %vm603_vm11, %v1258_v45, %v1255_v0 }
 0xdbb   : > { %1735 = vmatmul.msk.f32.vlgmr.msrb.gmra.mxu0 %vm474_vm1, %v2401_v8  ;;  %1736 = vmatmul.msk.f32.vlgmr.msrb.gmra.mxu1 %vm474_vm1, %v2401_v8 }
 0xe38   : > { %v1283_v43 = vpop.f32.mrf.mxu0  ;;  %v1303_v2 = vpop.f32.mrf.mxu1 }
 0xe39   : > { %v1284_v63 = vadd.f32 %v1283_v43, %v2195_v47  ;;  %v1304_v3 = vadd.f32 %v1303_v2, %v2201_v53 }
 0xe3b   : > { %1369 = vrot.lane.b32.xlu1 %v1304_v3, %s1873_s23  ;;  %1327 = vrot.lane.b32.xlu0 %v1284_v63, %s1873_s23  ;;  %v1306_v4 = vadd.f32 %v1284_v63, %v2180_v35  ;;  %v1348_v5 = vadd.f32 %v1304_v3, %v2204_v57 }
 0xe3d   : > { %v1737_v13 = vmul.f32 -1.442695, %v1306_v4  ;;  %v1738_v6 = vmul.f32 -1.442695, %v1348_v5 }
 0xe3f   : > { %1841 = vpow2.f32 %v1737_v13 }
 0xe40   : > { %1843 = vpow2.f32 %v1738_v6 }
 0xe45   : > { %v1842_v7 = vpop.eup %1841 }
 0xe46   : > { %v1844_v10 = vpop.eup %1843  ;;  %v1310_v11 = vadd.f32 1.0, %v1842_v7 }
 0xe47   : > { %v1352_v15 = vadd.f32 1.0, %v1844_v10 }
 0xe48   : > { %1845 = vrcp.f32 %v1310_v11  ;;  %vm1316_vm15 = vweird.f32 %v1310_v11  ;;  %v1322_v26 = vand.u32 2147483648, %v1310_v11  ;;  %v1320_v29 = vand.u32 2147483647, %v1310_v11 }
 0xe49   : > { %1847 = vrcp.f32 %v1352_v15  ;;  %v1364_v24 = vand.u32 2147483648, %v1352_v15  ;;  %vm1358_vm0 = vweird.f32 %v1352_v15  ;;  %v1362_v27 = vand.u32 2147483647, %v1352_v15 }
 0xe4a   : > { %v1323_v38 = vor.u32 1.1754944e-38, %v1322_v26  ;;  %vm1321_vm5 = vcmp.eq.f32.partialorder %v1320_v29, 8.507059e+37 }
 0xe4b   : > { %v1365_v36 = vor.u32 1.1754944e-38, %v1364_v24  ;;  %vm1363_vm4 = vcmp.eq.f32.partialorder %v1362_v27, 8.507059e+37 }
 0xe4e   : > { %v1846_v16 = vpop.eup %1845 }
 0xe4f   : > { %v1848_v17 = vpop.eup %1847  ;;  %v1312_v20 = vmul.f32 %v1846_v16, %v1310_v11  ;;  %vm1317_vm13 = vweird.f32 %v1846_v16 }
 0xe50   : > { %v1354_v18 = vmul.f32 %v1848_v17, %v1352_v15  ;;  %vm1359_vm14 = vweird.f32 %v1848_v17  ;;  %vm1318_vm2 = vmor %vm1316_vm15, %vm1317_vm13 }
 0xe51   : > { %v1313_v23 = vsub.f32 1.0, %v1312_v20  ;;  %vm1360_vm3 = vmor %vm1358_vm0, %vm1359_vm14 }
 0xe52   : > { %v1355_v21 = vsub.f32 1.0, %v1354_v18 }
 0xe53   : > { %v1314_v42 = vmul.f32 %v1846_v16, %v1313_v23 }
 0xe54   : > { %v1356_v25 = vmul.f32 %v1848_v17, %v1355_v21 }
 0xe55   : > { %v1315_v19 = vadd.f32 %v1846_v16, %v1314_v42 }
 0xe56   : > { %v1357_v14 = vadd.f32 %v1848_v17, %v1356_v25 }
 0xe57   : > { %v1319_v9 = vsel %vm1318_vm2, %v1846_v16, %v1315_v19 }
 0xe58   : > { %v1361_v32 = vsel %vm1360_vm3, %v1848_v17, %v1357_v14  ;;  %v1324_v52 = vsel %vm1321_vm5, %v1323_v38, %v1319_v9  ;;  %v1539_v38 = vld [vmem:[%s2499_s6 + $0x38] sm:$0xff] }
 0xe59   : > { %v1366_v37 = vsel %vm1363_vm4, %v1365_v36, %v1361_v32  ;;  %v1337_v28 = vsub.f32 1.0, %v1324_v52  ;;  %1576 = vmatpush.msra.mxu0 %v1539_v38 }
 0xe5a   : > { %v1385_v1 = vmul.f32 %v1366_v37, %v2401_v8 }
 0xead   : > { %v1370_v34 = vpop.permute.xlu1 %1369  ;;  %v1328_v40 = vpop.permute.xlu0 %1327 }
 0xeae   : > { %v1372_v44 = vmul.f32 %v1370_v34, %v1366_v37  ;;  %v1330_v12 = vmul.f32 %v1328_v40, %v1324_v52  ;;  %v1538_v34 = vld [vmem:[%s2499_s6 + $0x30] sm:$0xff] }
 0xeaf   : > { %1577 = vmatpush.msra.mxu0 %v1538_v34 }
 0xeb0   : > { %1374 = vrot.lane.b32.xlu0 %v1372_v44, %s1873_s23  ;;  %1332 = vrot.lane.b32.xlu2 %v1330_v12, %s1873_s23 }
 0xeb8   : > { %1343 = vrot.lane.b32.xlu2 %v2401_v8, %s1875_s26 }
 0xf0a   : > { %v1333_v30 = vpop.permute.xlu2 %1332 }
 0xf0b   : > { %v1335_v22 = vadd.f32 %v1333_v30, %v2180_v35  ;;  %v1379_v35 = vsub.f32 1.0, %v1366_v37 }
 0xf0d   : > { %1849 = vtanh.f32 %v1335_v22  ;;  %v1537_v22 = vld [vmem:[%s2499_s6 + $0x28] sm:$0xff] }
 0xf0e   : > { %1578 = vmatpush.msra.mxu0 %v1537_v22 }
 0xf12   : > { %v1344_v51 = vpop.permute.xlu2 %1343 }
 0xf13   : > { %v1850_v31 = vpop.eup %1849  ;;  %v1346_v55 = vmul.f32 %v1344_v51, %v1324_v52 }
 0xf14   : > { %1339 = vrot.lane.b32.xlu1 %v1850_v31, %s1874_s24  ;;  %v1536_v31 = vld [vmem:[%s2499_s6 + $0x20] sm:$0xff] }
 0xf15   : > { %1579 = vmatpush.msra.mxu0 %v1536_v31 }
 0xf22   : > { %v1375_v46 = vpop.permute.xlu0 %1374 }
 0xf23   : > { %v1377_v48 = vadd.f32 %v1375_v46, %v2204_v57  ;;  %v1533_v46 = vld [vmem:[%s2499_s6 + $0x8] sm:$0xff] }
 0xf25   : > { %1851 = vtanh.f32 %v1377_v48  ;;  %v1532_v48 = vld [vmem:[%s2499_s6] sm:$0xff] }
 0xf2b   : > { %v1852_v49 = vpop.eup %1851 }
 0xf2c   : > { %1381 = vrot.lane.b32.xlu0 %v1852_v49, %s1874_s24 }
 0xf86   : > { %v1340_v54 = vpop.permute.xlu1 %1339 }
 0xf87   : > { %v1342_v56 = vmul.f32 %v1340_v54, %v1337_v28 }
 0xf89   : > { %v1347_v58 = vadd.f32 %v1346_v55, %v1342_v56 }
 0xf8b   : > { %1388 = vrot.lane.b32.xlu1 %v1347_v58, %s1874_s24 }
 0xf9e   : > { %v1382_v60 = vpop.permute.xlu0 %1381 }
 0xf9f   : > { %v1384_v62 = vmul.f32 %v1382_v60, %v1379_v35 }
 0xfa1   : > { %v1386_v33 = vadd.f32 %v1385_v1, %v1384_v62 }
 0xfa3   : > { %1392 = vst.msk [vmem:[#allocation2 + $0x8] sm:$0xff] %vm605_vm10, %v1386_v33 }
 0xffd   : > { %v1389_v57 = vpop.permute.xlu1 %1388 }
 0xffe   : > { %1391 = vst.msk [vmem:[#allocation2 + $0x30] sm:$0xff] %vm603_vm11, %v1389_v57  ;;  %v2426_v59 = vsel %vm603_vm11, %v1389_v57, %v1386_v33  ;;  %v1525_v57 = vld [vmem:[#allocation2 + $0x8] sm:$0xff] }
 0xfff   : > { %1739 = vmatmul.msk.f32.vlgmr.msra.gmra.mxu2 %vm474_vm1, %v2426_v59  ;;  %1740 = vmatmul.msk.f32.vlgmr.msra.gmra.mxu3 %vm474_vm1, %v2426_v59 }
0x1082   : > { %v1414_v61 = vpop.f32.mrf.mxu2  ;;  %v1434_v0 = vpop.f32.mrf.mxu3 }
0x1083   : > { %v1415_v39 = vadd.f32 %v1414_v61, %v2195_v47  ;;  %v1435_v45 = vadd.f32 %v1434_v0, %v2201_v53  ;;  %v1526_v61 = vld [vmem:[#allocation2 + $0x10] sm:$0xff]  ;;  %v1528_v0 = vld [vmem:[#allocation2 + $0x20] sm:$0xff] }
0x1085   : > { %1500 = vrot.lane.b32.xlu2 %v1435_v45, %s1873_s23  ;;  %1458 = vrot.lane.b32.xlu0 %v1415_v39, %s1873_s23  ;;  %v1479_v8 = vadd.f32 %v1435_v45, %v2197_v50  ;;  %v1437_v3 = vadd.f32 %v1415_v39, %v2186_v41  ;;  %v1529_v39 = vld [vmem:[#allocation2 + $0x28] sm:$0xff]  ;;  %v1530_v45 = vld [vmem:[#allocation2 + $0x30] sm:$0xff] }
0x1087   : > { %v1742_v43 = vmul.f32 -1.442695, %v1479_v8  ;;  %v1741_v5 = vmul.f32 -1.442695, %v1437_v3 }
0x1089   : > { %1853 = vpow2.f32 %v1742_v43 }
0x108f   : > { %v1854_v2 = vpop.eup %1853 }
0x1090   : > { %v1483_v63 = vadd.f32 1.0, %v1854_v2  ;;  %v1768_v2 = vld [vmem:[%s2500_s7] ss:$0 sm:$0xff] }
0x1092   : > { %1855 = vrcp.f32 %v1483_v63  ;;  %v1495_v11 = vand.u32 2147483648, %v1483_v63  ;;  %vm1489_vm7 = vweird.f32 %v1483_v63  ;;  %v1493_v15 = vand.u32 2147483647, %v1483_v63 }
0x1093   : > { %1857 = vpow2.f32 %v1741_v5 }
0x1094   : > { %v1496_v17 = vor.u32 1.1754944e-38, %v1495_v11  ;;  %vm1494_vm9 = vcmp.eq.f32.partialorder %v1493_v15, 8.507059e+37 }
0x1098   : > { %v1856_v4 = vpop.eup %1855 }
0x1099   : > { %v1485_v13 = vmul.f32 %v1856_v4, %v1483_v63  ;;  %v1858_v6 = vpop.eup %1857  ;;  %vm1490_vm6 = vweird.f32 %v1856_v4 }
0x109a   : > { %v1441_v7 = vadd.f32 1.0, %v1858_v6  ;;  %vm1491_vm8 = vmor %vm1489_vm7, %vm1490_vm6 }
0x109b   : > { %v1486_v47 = vsub.f32 1.0, %v1485_v13 }
0x109c   : > { %1859 = vrcp.f32 %v1441_v7  ;;  %v1453_v24 = vand.u32 2147483648, %v1441_v7  ;;  %vm1447_vm13 = vweird.f32 %v1441_v7  ;;  %v1451_v26 = vand.u32 2147483647, %v1441_v7 }
0x109d   : > { %v1487_v53 = vmul.f32 %v1856_v4, %v1486_v47 }
0x109e   : > { %v1454_v29 = vor.u32 1.1754944e-38, %v1453_v24  ;;  %vm1452_vm15 = vcmp.eq.f32.partialorder %v1451_v26, 8.507059e+37 }
0x109f   : > { %v1488_v10 = vadd.f32 %v1856_v4, %v1487_v53 }
0x10a1   : > { %v1492_v16 = vsel %vm1491_vm8, %v1856_v4, %v1488_v10 }
0x10a2   : > { %v1497_v20 = vsel %vm1494_vm9, %v1496_v17, %v1492_v16  ;;  %v1860_v23 = vpop.eup %1859 }
0x10a3   : > { %v1443_v25 = vmul.f32 %v1860_v23, %v1441_v7  ;;  %vm1448_vm12 = vweird.f32 %v1860_v23  ;;  %v1510_v51 = vsub.f32 1.0, %v1497_v20  ;;  %v1516_v55 = vmul.f32 %v1497_v20, %v2426_v59 }
0x10a4   : > { %vm1449_vm14 = vmor %vm1447_vm13, %vm1448_vm12 }
0x10a5   : > { %v1444_v42 = vsub.f32 1.0, %v1443_v25 }
0x10a7   : > { %v1445_v14 = vmul.f32 %v1860_v23, %v1444_v42 }
0x10a9   : > { %v1446_v19 = vadd.f32 %v1860_v23, %v1445_v14 }
0x10ab   : > { %v1450_v27 = vsel %vm1449_vm14, %v1860_v23, %v1446_v19 }
0x10ac   : > { %v1455_v9 = vsel %vm1452_vm15, %v1454_v29, %v1450_v27 }
0x10ad   : > { %v1468_v54 = vsub.f32 1.0, %v1455_v9 }
0x10df   : > { %v1501_v18 = vpop.permute.xlu2 %1500 }
0x10e0   : > { %v1503_v21 = vmul.f32 %v1501_v18, %v1497_v20 }
0x10e2   : > { %1505 = vrot.lane.b32.xlu1 %v1503_v21, %s1873_s23 }
0x10f7   : > { %v1459_v32 = vpop.permute.xlu0 %1458 }
0x10f8   : > { %v1461_v36 = vmul.f32 %v1459_v32, %v1455_v9 }
0x10fa   : > { %1463 = vrot.lane.b32.xlu2 %v1461_v36, %s1873_s23 }
0x1102   : > { %1474 = vrot.lane.b32.xlu2 %v2426_v59, %s1875_s26  ;;  %v1527_v59 = vld [vmem:[#allocation2 + $0x18] sm:$0xff] }
0x1154   : > { %v1506_v37 = vpop.permute.xlu1 %1505  ;;  %v1464_v40 = vpop.permute.xlu2 %1463 }
0x1155   : > { %v1508_v52 = vadd.f32 %v1506_v37, %v2197_v50  ;;  %v1466_v44 = vadd.f32 %v1464_v40, %v2186_v41  ;;  %v1535_v41 = vld [vmem:[%s2499_s6 + $0x18] sm:$0xff]  ;;  %v1534_v50 = vld [vmem:[%s2499_s6 + $0x10] sm:$0xff] }
0x1156   : > { %1580 = vmatpush.msra.mxu0 %v1535_v41 }
0x1157   : > { %1861 = vtanh.f32 %v1508_v52 }
0x1158   : > { %1863 = vtanh.f32 %v1466_v44  ;;  %1581 = vmatpush.msra.mxu0 %v1534_v50 }
0x115a   : > { %1582 = vmatpush.msra.mxu0 %v1533_v46 }
0x115c   : > { %1583 = vmatpush.msra.mxu0 %v1532_v48  ;;  %v1475_v49 = vpop.permute.xlu2 %1474 }
0x115d   : > { %v1862_v12 = vpop.eup %1861  ;;  %v1477_v35 = vmul.f32 %v1475_v49, %v1455_v9 }
0x115e   : > { %v1864_v30 = vpop.eup %1863  ;;  %1512 = vrot.lane.b32.xlu0 %v1862_v12, %s1874_s24 }
0x115f   : > { %1470 = vrot.lane.b32.xlu1 %v1864_v30, %s1874_s24 }
0x11d0   : > { %v1513_v28 = vpop.permute.xlu0 %1512 }
0x11d1   : > { %v1515_v56 = vmul.f32 %v1513_v28, %v1510_v51  ;;  %v1471_v58 = vpop.permute.xlu1 %1470 }
0x11d2   : > { %v1473_v60 = vmul.f32 %v1471_v58, %v1468_v54 }
0x11d3   : > { %v1517_v1 = vadd.f32 %v1516_v55, %v1515_v56 }
0x11d4   : > { %v1478_v62 = vadd.f32 %v1477_v35, %v1473_v60 }
0x11d5   : > { %1523 = vst.msk [vmem:[#allocation2] sm:$0xff] %vm605_vm10, %v1517_v1 }
0x11d6   : > { %1519 = vrot.lane.b32.xlu0 %v1478_v62, %s1874_s24 }
0x11dc   : > { %v1524_v33 = vld [vmem:[#allocation2] sm:$0xff] }
0x11dd   : > { %1743 = vmatmul.msk.f32.vlgmr.msra.gmra.mxu0 %vm474_vm1, %v1524_v33 }
0x11e5   : > { %1744 = vmatmul.msk.f32.gmra.mxu0 %vm474_vm1, %v1525_v57 }
0x11ed   : > { %1745 = vmatmul.msk.f32.gmra.mxu0 %vm474_vm1, %v1526_v61 }
0x11f5   : > { %1746 = vmatmul.msk.f32.gmra.mxu0 %vm474_vm1, %v1527_v59 }
0x11fd   : > { %1747 = vmatmul.msk.f32.gmra.mxu0 %vm474_vm1, %v1528_v0 }
0x1205   : > { %1748 = vmatmul.msk.f32.gmra.mxu0 %vm474_vm1, %v1529_v39 }
0x120d   : > { %1749 = vmatmul.msk.f32.gmra.mxu0 %vm474_vm1, %v1530_v45 }
0x1248   : > { %v1520_v8 = vpop.permute.xlu0 %1519 }
0x1249   : > { %1522 = vst.msk [vmem:[#allocation2 + $0x38] sm:$0xff] %vm603_vm11, %v1520_v8 }
0x1250   : > { %v1531_v43 = vld [vmem:[#allocation2 + $0x38] sm:$0xff] }
0x1251   : > { %1750 = vmatmul.msk.f32.gmra.mxu0 %vm474_vm1, %v1531_v43 }
0x125a   : > { %v1585_v63 = vpop.f32.mrf.mxu0 }
0x125b   : > { %v1586_v3 = vadd.f32 %v1768_v2, %v1585_v63 }
0x125d   : > { %1609 = vst [vmem:[%s324_s30] sm:$0xff] %v1586_v3 }
0x1262   : > { %v1588_v4 = vpop.f32.mrf.mxu0 }
0x1263   : > { %v1589_v5 = vadd.f32 %v1768_v2, %v1588_v4 }
0x1265   : > { %1610 = vst [vmem:[%s324_s30 + $0x8] sm:$0xff] %v1589_v5 }
0x126a   : > { %v1591_v13 = vpop.f32.mrf.mxu0 }
0x126b   : > { %v1592_v47 = vadd.f32 %v1768_v2, %v1591_v13 }
0x126d   : > { %1611 = vst [vmem:[%s324_s30 + $0x10] sm:$0xff] %v1592_v47 }
0x1272   : > { %v1594_v6 = vpop.f32.mrf.mxu0 }
0x1273   : > { %v1595_v53 = vadd.f32 %v1768_v2, %v1594_v6 }
0x1275   : > { %1612 = vst [vmem:[%s324_s30 + $0x18] sm:$0xff] %v1595_v53 }
0x127a   : > { %v1597_v7 = vpop.f32.mrf.mxu0 }
0x127b   : > { %v1598_v10 = vadd.f32 %v1768_v2, %v1597_v7 }
0x127d   : > { %1613 = vst [vmem:[%s324_s30 + $0x20] sm:$0xff] %v1598_v10 }
0x1282   : > { %v1600_v11 = vpop.f32.mrf.mxu0 }
0x1283   : > { %v1601_v15 = vadd.f32 %v1768_v2, %v1600_v11 }
0x1285   : > { %1614 = vst [vmem:[%s324_s30 + $0x28] sm:$0xff] %v1601_v15 }
0x128a   : > { %v1603_v16 = vpop.f32.mrf.mxu0 }
0x128b   : > { %v1604_v17 = vadd.f32 %v1768_v2, %v1603_v16 }
0x128d   : > { %1615 = vst [vmem:[%s324_s30 + $0x30] sm:$0xff] %v1604_v17 }
0x12ce   : > { %v1606_v18 = vpop.f32.mrf.mxu0 }
0x12cf   : > { %v1607_v20 = vadd.f32 %v1768_v2, %v1606_v18 }
0x12d1   : > { %1616 = vst [vmem:[%s324_s30 + $0x38] sm:$0xff] %v1607_v20 }
0x12d2 PF: > { %s18_s27 = sadd.s32 1, %s1871_s27  }
0x12d3   : > { %p15_p5 = scmp.ge.s32.totalorder %s18_s27, 4  }
0x12d5   :  { %17 = sbr.rel (!%p15_p5) target bundleno = 1 (0x1), region = 85 }

</bundles_post_ra>
